<compile_context>
chip_gen: v5e
topology: v5e:2x2
jax: 0.10.0
libtpu: 0.0.40
codegen_flags: <defaults>
</compile_context>

<pallas_src>
import functools

import jax
import jax.numpy as jnp
from jax.experimental import pallas as pl
from jax.experimental.pallas import tpu as pltpu


# ----------------------------------------------------------------------------
# Row indices into the packed (NUM_VEC_ROWS, P) bias / LayerNorm-param array.
# ----------------------------------------------------------------------------
(FC1_B,
 R1_FC1_B, R1_LN1_G, R1_LN1_B, R1_FC2_B, R1_LN2_G, R1_LN2_B, R1_PROJ_B,
 R2_FC1_B, R2_LN1_G, R2_LN1_B, R2_FC2_B, R2_LN2_G, R2_LN2_B, R2_PROJ_B,
 FC2_B, LN_G, LN_B, FC_OUT_B) = range(19)
NUM_VEC_ROWS = 24  # padded up to a multiple of 8 sublanes


def _round_up(n, m):
    return ((n + m - 1) // m) * m


# ----------------------------------------------------------------------------
# Pallas kernel: whole PolicyNet forward for one (TB, *) batch tile.
# ----------------------------------------------------------------------------
def policy_net_kernel(
    x_ref,
    fc1_w, r1_fc1_w, r1_fc2_w, r1_proj_w,
    r2_fc1_w, r2_fc2_w, r2_proj_w, fc2_w, fc_out_w,
    vec_ref,
    out_ref,
    *, act_dims, pad_dims,
):
    H, H2, A = act_dims          # actual (unpadded) feature dims
    Hp, H2p, Ap = pad_dims       # 128-padded feature dims

    def row(idx, dp):
        # (1, dp) f32 parameter vector, static slice of the packed array.
        return vec_ref[idx:idx + 1, :dp]

    def linear(h, w_ref, b_row, dp):
        # bf16 (or f32) MXU inputs, f32 accumulation, f32 bias add.
        y = jnp.dot(h.astype(w_ref.dtype), w_ref[...],
                    preferred_element_type=jnp.float32)
        return y + row(b_row, dp)

    def layer_norm(y, g_row, b_row, d, dp, eps=1e-5):
        # One-pass statistics.  Padded lanes of y are exactly zero (zero-padded
        # weight columns + zero bias), so plain lane sums divided by the actual
        # dim give the correct mean / E[x^2].
        inv_d = 1.0 / float(d)
        mu = jnp.sum(y, axis=-1, keepdims=True) * inv_d
        ex2 = jnp.sum(y * y, axis=-1, keepdims=True) * inv_d
        var = ex2 - mu * mu
        xhat = (y - mu) * jax.lax.rsqrt(var + eps)
        # gamma/beta are zero in padded lanes -> output padded lanes stay zero.
        return xhat * row(g_row, dp) + row(b_row, dp)

    x = x_ref[...].astype(jnp.float32)

    # fc1 + relu
    h = jax.nn.relu(linear(x, fc1_w, FC1_B, Hp))

    # res1: H -> 2H
    res = linear(h, r1_proj_w, R1_PROJ_B, H2p)
    t = jax.nn.relu(layer_norm(linear(h, r1_fc1_w, R1_FC1_B, H2p),
                               R1_LN1_G, R1_LN1_B, H2, H2p))
    # dropout(p=0.1) -> identity in eval mode
    t = linear(t, r1_fc2_w, R1_FC2_B, H2p)
    t = layer_norm(t, R1_LN2_G, R1_LN2_B, H2, H2p)
    h = jax.nn.relu(t + res)

    # res2: 2H -> H
    res = linear(h, r2_proj_w, R2_PROJ_B, Hp)
    t = jax.nn.relu(layer_norm(linear(h, r2_fc1_w, R2_FC1_B, Hp),
                               R2_LN1_G, R2_LN1_B, H, Hp))
    t = linear(t, r2_fc2_w, R2_FC2_B, Hp)
    t = layer_norm(t, R2_LN2_G, R2_LN2_B, H, Hp)
    h = jax.nn.relu(t + res)

    # fc2 -> layer_norm -> relu
    h = jax.nn.relu(layer_norm(linear(h, fc2_w, FC2_B, Hp), LN_G, LN_B, H, Hp))

    # fc_out -> softmax(logits / temperature), temperature = 1.0
    logits = linear(h, fc_out_w, FC_OUT_B, Ap)
    lane = jax.lax.broadcasted_iota(jnp.int32, logits.shape, 1)
    logits = jnp.where(lane < A, logits, -1e30)      # mask padded action lanes
    m = jnp.max(logits, axis=-1, keepdims=True)
    e = jnp.exp(logits - m)
    s = jnp.sum(e, axis=-1, keepdims=True)
    out_ref[...] = (e * pl.reciprocal(s, approx=True)).astype(out_ref.dtype)


# ----------------------------------------------------------------------------
# Host-side parameter packing / padding.
# ----------------------------------------------------------------------------
def pack_params(params, state_size, action_size, hidden_size,
                weight_dtype=jnp.bfloat16):
    S, H, H2, A = state_size, hidden_size, 2 * hidden_size, action_size
    Sp, Hp, H2p, Ap = (_round_up(d, 128) for d in (S, H, H2, A))
    P = max(Hp, H2p, Ap)

    def pad_w(w, rp, cp):
        r, c = w.shape
        out = jnp.zeros((rp, cp), weight_dtype)
        return out.at[:r, :c].set(w.astype(weight_dtype))

    weights = [
        pad_w(params["fc1_w"], Sp, Hp),
        pad_w(params["r1_fc1_w"], Hp, H2p),
        pad_w(params["r1_fc2_w"], H2p, H2p),
        pad_w(params["r1_proj_w"], Hp, H2p),
        pad_w(params["r2_fc1_w"], H2p, Hp),
        pad_w(params["r2_fc2_w"], Hp, Hp),
        pad_w(params["r2_proj_w"], H2p, Hp),
        pad_w(params["fc2_w"], Hp, Hp),
        pad_w(params["fc_out_w"], Hp, Ap),
    ]

    vec = jnp.zeros((NUM_VEC_ROWS, P), jnp.float32)

    def put(vec, row_idx, v):
        v = jnp.asarray(v, jnp.float32).reshape(-1)
        return vec.at[row_idx, :v.shape[0]].set(v)

    vec = put(vec, FC1_B, params["fc1_b"])
    vec = put(vec, R1_FC1_B, params["r1_fc1_b"])
    vec = put(vec, R1_LN1_G, params["r1_ln1_g"])
    vec = put(vec, R1_LN1_B, params["r1_ln1_b"])
    vec = put(vec, R1_FC2_B, params["r1_fc2_b"])
    vec = put(vec, R1_LN2_G, params["r1_ln2_g"])
    vec = put(vec, R1_LN2_B, params["r1_ln2_b"])
    vec = put(vec, R1_PROJ_B, params["r1_proj_b"])
    vec = put(vec, R2_FC1_B, params["r2_fc1_b"])
    vec = put(vec, R2_LN1_G, params["r2_ln1_g"])
    vec = put(vec, R2_LN1_B, params["r2_ln1_b"])
    vec = put(vec, R2_FC2_B, params["r2_fc2_b"])
    vec = put(vec, R2_LN2_G, params["r2_ln2_g"])
    vec = put(vec, R2_LN2_B, params["r2_ln2_b"])
    vec = put(vec, R2_PROJ_B, params["r2_proj_b"])
    vec = put(vec, FC2_B, params["fc2_b"])
    vec = put(vec, LN_G, params["ln_g"])
    vec = put(vec, LN_B, params["ln_b"])
    vec = put(vec, FC_OUT_B, params["fc_out_b"])

    return weights, vec, (H, H2, A), (Sp, Hp, H2p, Ap)


# ----------------------------------------------------------------------------
# Wrapper
# ----------------------------------------------------------------------------
def policy_net_forward(x, params, state_size, action_size, hidden_size,
                       *, block_b=256, weight_dtype=jnp.bfloat16):
    weights, vec, act_dims, pad_dims = pack_params(
        params, state_size, action_size, hidden_size, weight_dtype)
    Sp, Hp, H2p, Ap = pad_dims

    B = x.shape[0]
    TB = min(block_b, _round_up(B, 8))   # batch tile, multiple of 8 sublanes
    Bp = _round_up(B, TB)

    # zero-pad batch and state lanes (padded lanes hit zero weight rows).
    xp = jnp.zeros((Bp, Sp), jnp.float32).at[:B, :state_size].set(
        x.astype(jnp.float32))

    kernel = functools.partial(policy_net_kernel,
                               act_dims=act_dims,
                               pad_dims=(Hp, H2p, Ap))

    def resident(shape):
        # Weights / packed params: same block every grid step -> stay in VMEM.
        return pl.BlockSpec(shape, lambda i: (0, 0))

    out = pl.pallas_call(
        kernel,
        out_shape=jax.ShapeDtypeStruct((Bp, Ap), jnp.float32),
        grid=(Bp // TB,),
        in_specs=[pl.BlockSpec((TB, Sp), lambda i: (i, 0))]
                 + [resident(w.shape) for w in weights]
                 + [resident(vec.shape)],
        out_specs=pl.BlockSpec((TB, Ap), lambda i: (i, 0)),
        compiler_params=pltpu.CompilerParams(
            dimension_semantics=("parallel",),       # shard batch across TCs (v7x)
            vmem_limit_bytes=64 * 1024 * 1024,
        ),
    )(xp, *weights, vec)

    return out[:B, :action_size]


# ----------------------------------------------------------------------------
# Pure-JAX reference (unpadded, f32) for correctness checking.
# ----------------------------------------------------------------------------
def policy_net_reference(x, params):
    def linear(h, w, b):
        return h @ w + b

    def ln(h, g, b, eps=1e-5):
        mu = jnp.mean(h, axis=-1, keepdims=True)
        var = jnp.mean(jnp.square(h - mu), axis=-1, keepdims=True)
        return (h - mu) / jnp.sqrt(var + eps) * g + b

    def res_block(h, p):
        r = linear(h, params[p + "_proj_w"], params[p + "_proj_b"])
        t = jax.nn.relu(ln(linear(h, params[p + "_fc1_w"], params[p + "_fc1_b"]),
                           params[p + "_ln1_g"], params[p + "_ln1_b"]))
        t = linear(t, params[p + "_fc2_w"], params[p + "_fc2_b"])
        t = ln(t, params[p + "_ln2_g"], params[p + "_ln2_b"])
        return jax.nn.relu(t + r)

    h = jax.nn.relu(linear(x, params["fc1_w"], params["fc1_b"]))
    h = res_block(h, "r1")
    h = res_block(h, "r2")
    h = jax.nn.relu(ln(linear(h, params["fc2_w"], params["fc2_b"]),
                       params["ln_g"], params["ln_b"]))
    logits = linear(h, params["fc_out_w"], params["fc_out_b"])
    return jax.nn.softmax(logits, axis=-1)


# ----------------------------------------------------------------------------
# Deterministic parameter init (orthogonal weights, gain sqrt(2); zero biases;
# LayerNorm gamma=1, beta=0; fc_out weights scaled by 0.01), matching
# PolicyNet._init_weights semantics with a JAX PRNG instead of torch's.
# ----------------------------------------------------------------------------
def _orthogonal(key, out_dim, in_dim, gain):
    rows, cols = out_dim, in_dim
    a = jax.random.normal(key, (rows, cols), dtype=jnp.float32)
    if rows < cols:
        a = a.T
    q, r = jnp.linalg.qr(a)
    q = q * jnp.sign(jnp.diag(r))
    if rows < cols:
        q = q.T
    return gain * q  # shape (out_dim, in_dim)


def init_params(key, state_size, action_size, hidden_size):
    gain = float(jnp.sqrt(2.0))
    H, H2 = hidden_size, hidden_size * 2
    keys = jax.random.split(key, 9)

    def lin(k, in_dim, out_dim, scale=1.0):
        w = _orthogonal(k, out_dim, in_dim, gain) * scale   # torch shape (out, in)
        return w.T.astype(jnp.float32), jnp.zeros((1, out_dim), jnp.float32)

    def ln(dim):
        return jnp.ones((1, dim), jnp.float32), jnp.zeros((1, dim), jnp.float32)

    p = {}
    p["fc1_w"], p["fc1_b"] = lin(keys[0], state_size, H)
    # res1: H -> 2H
    p["r1_fc1_w"], p["r1_fc1_b"] = lin(keys[1], H, H2)
    p["r1_fc2_w"], p["r1_fc2_b"] = lin(keys[2], H2, H2)
    p["r1_ln1_g"], p["r1_ln1_b"] = ln(H2)
    p["r1_ln2_g"], p["r1_ln2_b"] = ln(H2)
    p["r1_proj_w"], p["r1_proj_b"] = lin(keys[3], H, H2)
    # res2: 2H -> H
    p["r2_fc1_w"], p["r2_fc1_b"] = lin(keys[4], H2, H)
    p["r2_fc2_w"], p["r2_fc2_b"] = lin(keys[5], H, H)
    p["r2_ln1_g"], p["r2_ln1_b"] = ln(H)
    p["r2_ln2_g"], p["r2_ln2_b"] = ln(H)
    p["r2_proj_w"], p["r2_proj_b"] = lin(keys[6], H2, H)
    # tail
    p["fc2_w"], p["fc2_b"] = lin(keys[7], H, H)
    p["ln_g"], p["ln_b"] = ln(H)
    p["fc_out_w"], p["fc_out_b"] = lin(keys[8], H, action_size, scale=0.01)
    return p


if __name__ == "__main__":
    STATE_SIZE = 16
    ACTION_SIZE = 8
    HIDDEN_SIZE = 32
    BATCH = 16       # small test; block_b=8 -> 2-step batch grid

    key = jax.random.PRNGKey(0)
    k_params, k_x = jax.random.split(key)
    params = init_params(k_params, STATE_SIZE, ACTION_SIZE, HIDDEN_SIZE)
    x = jax.random.normal(k_x, (BATCH, STATE_SIZE), dtype=jnp.float32)

    probs = policy_net_forward(x, params, STATE_SIZE, ACTION_SIZE, HIDDEN_SIZE,
                               block_b=8)
    probs = jax.block_until_ready(probs)

    # sanity: shape + softmax rows sum to 1 (approx reciprocal -> loose tol)
    assert probs.shape == (BATCH, ACTION_SIZE)
    assert bool(jnp.all(jnp.abs(jnp.sum(probs, axis=-1) - 1.0) < 1e-2))

    # numerical check against a pure-JAX f32 reference (bf16-class tolerance)
    ref = policy_net_reference(x, params)
    max_err = float(jnp.max(jnp.abs(probs - ref)))
    assert max_err < 1e-2, f"max abs err vs reference: {max_err}"

    print("KERNEL_OK")
</pallas_src>

<mosaic_0001>
module attributes {stable_mosaic.version = 11 : i64} {
  func.func @policy_net_kernel(%arg0: i32, %arg1: memref<8x128xf32, #tpu.memory_space<vmem>>, %arg2: memref<128x128xbf16, #tpu.memory_space<vmem>>, %arg3: memref<128x128xbf16, #tpu.memory_space<vmem>>, %arg4: memref<128x128xbf16, #tpu.memory_space<vmem>>, %arg5: memref<128x128xbf16, #tpu.memory_space<vmem>>, %arg6: memref<128x128xbf16, #tpu.memory_space<vmem>>, %arg7: memref<128x128xbf16, #tpu.memory_space<vmem>>, %arg8: memref<128x128xbf16, #tpu.memory_space<vmem>>, %arg9: memref<128x128xbf16, #tpu.memory_space<vmem>>, %arg10: memref<128x128xbf16, #tpu.memory_space<vmem>>, %arg11: memref<24x128xf32, #tpu.memory_space<vmem>>, %arg12: memref<8x128xf32, #tpu.memory_space<vmem>>) attributes {dimension_semantics = [#tpu.dimension_semantics<parallel>], iteration_bounds = array<i64: 2>, scalar_prefetch = 0 : i64, scratch_operands = 0 : i64, tpu.core_type = #tpu.core_type<tc>, window_params = [{transform_indices = @transform_0, window_bounds = array<i64: 8, 128>}, {pipeline_mode = #tpu.pipeline_mode<synchronous>, transform_indices = @transform_1, window_bounds = array<i64: 128, 128>}, {pipeline_mode = #tpu.pipeline_mode<synchronous>, transform_indices = @transform_2, window_bounds = array<i64: 128, 128>}, {pipeline_mode = #tpu.pipeline_mode<synchronous>, transform_indices = @transform_3, window_bounds = array<i64: 128, 128>}, {pipeline_mode = #tpu.pipeline_mode<synchronous>, transform_indices = @transform_4, window_bounds = array<i64: 128, 128>}, {pipeline_mode = #tpu.pipeline_mode<synchronous>, transform_indices = @transform_5, window_bounds = array<i64: 128, 128>}, {pipeline_mode = #tpu.pipeline_mode<synchronous>, transform_indices = @transform_6, window_bounds = array<i64: 128, 128>}, {pipeline_mode = #tpu.pipeline_mode<synchronous>, transform_indices = @transform_7, window_bounds = array<i64: 128, 128>}, {pipeline_mode = #tpu.pipeline_mode<synchronous>, transform_indices = @transform_8, window_bounds = array<i64: 128, 128>}, {pipeline_mode = #tpu.pipeline_mode<synchronous>, transform_indices = @transform_9, window_bounds = array<i64: 128, 128>}, {pipeline_mode = #tpu.pipeline_mode<synchronous>, transform_indices = @transform_10, window_bounds = array<i64: 24, 128>}, {transform_indices = @transform_11, window_bounds = array<i64: 8, 128>}]} {
    %c0 = arith.constant 0 : index
    %c0_0 = arith.constant 0 : index
    %0 = vector.load %arg1[%c0, %c0_0] : memref<8x128xf32, #tpu.memory_space<vmem>>, vector<8x128xf32>
    %1 = arith.truncf %0 : vector<8x128xf32> to vector<8x128xbf16>
    %c0_1 = arith.constant 0 : index
    %c0_2 = arith.constant 0 : index
    %2 = vector.load %arg2[%c0_1, %c0_2] : memref<128x128xbf16, #tpu.memory_space<vmem>>, vector<128x128xbf16>
    %cst = arith.constant dense<0.000000e+00> : vector<8x128xf32>
    %3 = tpu.matmul %1, %2, %cst {dimension_numbers = #tpu.dot_dimension_numbers<[1], [0], [0], [1], [0, 0, 1, 1], [], []>} : vector<8x128xbf16>, vector<128x128xbf16>, vector<8x128xf32> -> vector<8x128xf32>
    %c0_3 = arith.constant 0 : index
    %c0_4 = arith.constant 0 : index
    %4 = vector.load %arg11[%c0_3, %c0_4] : memref<24x128xf32, #tpu.memory_space<vmem>>, vector<1x128xf32>
    %5 = vector.broadcast %4 : vector<1x128xf32> to vector<8x128xf32>
    %6 = arith.addf %3, %5 : vector<8x128xf32>
    %cst_5 = arith.constant 0.000000e+00 : f32
    %7 = vector.broadcast %cst_5 : f32 to vector<8x128xf32>
    %8 = arith.maximumf %6, %7 : vector<8x128xf32>
    %9 = arith.truncf %8 : vector<8x128xf32> to vector<8x128xbf16>
    %c0_6 = arith.constant 0 : index
    %c0_7 = arith.constant 0 : index
    %10 = vector.load %arg5[%c0_6, %c0_7] : memref<128x128xbf16, #tpu.memory_space<vmem>>, vector<128x128xbf16>
    %cst_8 = arith.constant dense<0.000000e+00> : vector<8x128xf32>
    %11 = tpu.matmul %9, %10, %cst_8 {dimension_numbers = #tpu.dot_dimension_numbers<[1], [0], [0], [1], [0, 0, 1, 1], [], []>} : vector<8x128xbf16>, vector<128x128xbf16>, vector<8x128xf32> -> vector<8x128xf32>
    %c7 = arith.constant 7 : index
    %c0_9 = arith.constant 0 : index
    %12 = vector.load %arg11[%c7, %c0_9] : memref<24x128xf32, #tpu.memory_space<vmem>>, vector<1x128xf32>
    %13 = vector.broadcast %12 : vector<1x128xf32> to vector<8x128xf32>
    %14 = arith.addf %11, %13 : vector<8x128xf32>
    %15 = arith.truncf %8 : vector<8x128xf32> to vector<8x128xbf16>
    %c0_10 = arith.constant 0 : index
    %c0_11 = arith.constant 0 : index
    %16 = vector.load %arg3[%c0_10, %c0_11] : memref<128x128xbf16, #tpu.memory_space<vmem>>, vector<128x128xbf16>
    %cst_12 = arith.constant dense<0.000000e+00> : vector<8x128xf32>
    %17 = tpu.matmul %15, %16, %cst_12 {dimension_numbers = #tpu.dot_dimension_numbers<[1], [0], [0], [1], [0, 0, 1, 1], [], []>} : vector<8x128xbf16>, vector<128x128xbf16>, vector<8x128xf32> -> vector<8x128xf32>
    %c1 = arith.constant 1 : index
    %c0_13 = arith.constant 0 : index
    %18 = vector.load %arg11[%c1, %c0_13] : memref<24x128xf32, #tpu.memory_space<vmem>>, vector<1x128xf32>
    %19 = vector.broadcast %18 : vector<1x128xf32> to vector<8x128xf32>
    %20 = arith.addf %17, %19 : vector<8x128xf32>
    %cst_14 = arith.constant dense<0.000000e+00> : vector<8xf32>
    %21 = vector.multi_reduction <add>, %20, %cst_14 [1] : vector<8x128xf32> to vector<8xf32>
    %22 = vector.shape_cast %21 : vector<8xf32> to vector<8x1xf32>
    %cst_15 = arith.constant 1.562500e-02 : f32
    %23 = vector.broadcast %cst_15 : f32 to vector<8x1xf32>
    %24 = arith.mulf %22, %23 : vector<8x1xf32>
    %25 = arith.mulf %20, %20 : vector<8x128xf32>
    %cst_16 = arith.constant dense<0.000000e+00> : vector<8xf32>
    %26 = vector.multi_reduction <add>, %25, %cst_16 [1] : vector<8x128xf32> to vector<8xf32>
    %27 = vector.shape_cast %26 : vector<8xf32> to vector<8x1xf32>
    %cst_17 = arith.constant 1.562500e-02 : f32
    %28 = vector.broadcast %cst_17 : f32 to vector<8x1xf32>
    %29 = arith.mulf %27, %28 : vector<8x1xf32>
    %30 = arith.mulf %24, %24 : vector<8x1xf32>
    %31 = arith.subf %29, %30 : vector<8x1xf32>
    %32 = vector.broadcast %24 : vector<8x1xf32> to vector<8x128xf32>
    %33 = arith.subf %20, %32 : vector<8x128xf32>
    %cst_18 = arith.constant 9.99999974E-6 : f32
    %34 = vector.broadcast %cst_18 : f32 to vector<8x1xf32>
    %35 = arith.addf %31, %34 : vector<8x1xf32>
    %36 = math.rsqrt %35 : vector<8x1xf32>
    %37 = vector.broadcast %36 : vector<8x1xf32> to vector<8x128xf32>
    %38 = arith.mulf %33, %37 : vector<8x128xf32>
    %c2 = arith.constant 2 : index
    %c0_19 = arith.constant 0 : index
    %39 = vector.load %arg11[%c2, %c0_19] : memref<24x128xf32, #tpu.memory_space<vmem>>, vector<1x128xf32>
    %40 = vector.broadcast %39 : vector<1x128xf32> to vector<8x128xf32>
    %41 = arith.mulf %38, %40 : vector<8x128xf32>
    %c3 = arith.constant 3 : index
    %c0_20 = arith.constant 0 : index
    %42 = vector.load %arg11[%c3, %c0_20] : memref<24x128xf32, #tpu.memory_space<vmem>>, vector<1x128xf32>
    %43 = vector.broadcast %42 : vector<1x128xf32> to vector<8x128xf32>
    %44 = arith.addf %41, %43 : vector<8x128xf32>
    %cst_21 = arith.constant 0.000000e+00 : f32
    %45 = vector.broadcast %cst_21 : f32 to vector<8x128xf32>
    %46 = arith.maximumf %44, %45 : vector<8x128xf32>
    %47 = arith.truncf %46 : vector<8x128xf32> to vector<8x128xbf16>
    %c0_22 = arith.constant 0 : index
    %c0_23 = arith.constant 0 : index
    %48 = vector.load %arg4[%c0_22, %c0_23] : memref<128x128xbf16, #tpu.memory_space<vmem>>, vector<128x128xbf16>
    %cst_24 = arith.constant dense<0.000000e+00> : vector<8x128xf32>
    %49 = tpu.matmul %47, %48, %cst_24 {dimension_numbers = #tpu.dot_dimension_numbers<[1], [0], [0], [1], [0, 0, 1, 1], [], []>} : vector<8x128xbf16>, vector<128x128xbf16>, vector<8x128xf32> -> vector<8x128xf32>
    %c4 = arith.constant 4 : index
    %c0_25 = arith.constant 0 : index
    %50 = vector.load %arg11[%c4, %c0_25] : memref<24x128xf32, #tpu.memory_space<vmem>>, vector<1x128xf32>
    %51 = vector.broadcast %50 : vector<1x128xf32> to vector<8x128xf32>
    %52 = arith.addf %49, %51 : vector<8x128xf32>
    %cst_26 = arith.constant dense<0.000000e+00> : vector<8xf32>
    %53 = vector.multi_reduction <add>, %52, %cst_26 [1] : vector<8x128xf32> to vector<8xf32>
    %54 = vector.shape_cast %53 : vector<8xf32> to vector<8x1xf32>
    %cst_27 = arith.constant 1.562500e-02 : f32
    %55 = vector.broadcast %cst_27 : f32 to vector<8x1xf32>
    %56 = arith.mulf %54, %55 : vector<8x1xf32>
    %57 = arith.mulf %52, %52 : vector<8x128xf32>
    %cst_28 = arith.constant dense<0.000000e+00> : vector<8xf32>
    %58 = vector.multi_reduction <add>, %57, %cst_28 [1] : vector<8x128xf32> to vector<8xf32>
    %59 = vector.shape_cast %58 : vector<8xf32> to vector<8x1xf32>
    %cst_29 = arith.constant 1.562500e-02 : f32
    %60 = vector.broadcast %cst_29 : f32 to vector<8x1xf32>
    %61 = arith.mulf %59, %60 : vector<8x1xf32>
    %62 = arith.mulf %56, %56 : vector<8x1xf32>
    %63 = arith.subf %61, %62 : vector<8x1xf32>
    %64 = vector.broadcast %56 : vector<8x1xf32> to vector<8x128xf32>
    %65 = arith.subf %52, %64 : vector<8x128xf32>
    %cst_30 = arith.constant 9.99999974E-6 : f32
    %66 = vector.broadcast %cst_30 : f32 to vector<8x1xf32>
    %67 = arith.addf %63, %66 : vector<8x1xf32>
    %68 = math.rsqrt %67 : vector<8x1xf32>
    %69 = vector.broadcast %68 : vector<8x1xf32> to vector<8x128xf32>
    %70 = arith.mulf %65, %69 : vector<8x128xf32>
    %c5 = arith.constant 5 : index
    %c0_31 = arith.constant 0 : index
    %71 = vector.load %arg11[%c5, %c0_31] : memref<24x128xf32, #tpu.memory_space<vmem>>, vector<1x128xf32>
    %72 = vector.broadcast %71 : vector<1x128xf32> to vector<8x128xf32>
    %73 = arith.mulf %70, %72 : vector<8x128xf32>
    %c6 = arith.constant 6 : index
    %c0_32 = arith.constant 0 : index
    %74 = vector.load %arg11[%c6, %c0_32] : memref<24x128xf32, #tpu.memory_space<vmem>>, vector<1x128xf32>
    %75 = vector.broadcast %74 : vector<1x128xf32> to vector<8x128xf32>
    %76 = arith.addf %73, %75 : vector<8x128xf32>
    %77 = arith.addf %76, %14 : vector<8x128xf32>
    %cst_33 = arith.constant 0.000000e+00 : f32
    %78 = vector.broadcast %cst_33 : f32 to vector<8x128xf32>
    %79 = arith.maximumf %77, %78 : vector<8x128xf32>
    %80 = arith.truncf %79 : vector<8x128xf32> to vector<8x128xbf16>
    %c0_34 = arith.constant 0 : index
    %c0_35 = arith.constant 0 : index
    %81 = vector.load %arg8[%c0_34, %c0_35] : memref<128x128xbf16, #tpu.memory_space<vmem>>, vector<128x128xbf16>
    %cst_36 = arith.constant dense<0.000000e+00> : vector<8x128xf32>
    %82 = tpu.matmul %80, %81, %cst_36 {dimension_numbers = #tpu.dot_dimension_numbers<[1], [0], [0], [1], [0, 0, 1, 1], [], []>} : vector<8x128xbf16>, vector<128x128xbf16>, vector<8x128xf32> -> vector<8x128xf32>
    %c14 = arith.constant 14 : index
    %c0_37 = arith.constant 0 : index
    %83 = vector.load %arg11[%c14, %c0_37] : memref<24x128xf32, #tpu.memory_space<vmem>>, vector<1x128xf32>
    %84 = vector.broadcast %83 : vector<1x128xf32> to vector<8x128xf32>
    %85 = arith.addf %82, %84 : vector<8x128xf32>
    %86 = arith.truncf %79 : vector<8x128xf32> to vector<8x128xbf16>
    %c0_38 = arith.constant 0 : index
    %c0_39 = arith.constant 0 : index
    %87 = vector.load %arg6[%c0_38, %c0_39] : memref<128x128xbf16, #tpu.memory_space<vmem>>, vector<128x128xbf16>
    %cst_40 = arith.constant dense<0.000000e+00> : vector<8x128xf32>
    %88 = tpu.matmul %86, %87, %cst_40 {dimension_numbers = #tpu.dot_dimension_numbers<[1], [0], [0], [1], [0, 0, 1, 1], [], []>} : vector<8x128xbf16>, vector<128x128xbf16>, vector<8x128xf32> -> vector<8x128xf32>
    %c8 = arith.constant 8 : index
    %c0_41 = arith.constant 0 : index
    %89 = vector.load %arg11[%c8, %c0_41] : memref<24x128xf32, #tpu.memory_space<vmem>>, vector<1x128xf32>
    %90 = vector.broadcast %89 : vector<1x128xf32> to vector<8x128xf32>
    %91 = arith.addf %88, %90 : vector<8x128xf32>
    %cst_42 = arith.constant dense<0.000000e+00> : vector<8xf32>
    %92 = vector.multi_reduction <add>, %91, %cst_42 [1] : vector<8x128xf32> to vector<8xf32>
    %93 = vector.shape_cast %92 : vector<8xf32> to vector<8x1xf32>
    %cst_43 = arith.constant 3.125000e-02 : f32
    %94 = vector.broadcast %cst_43 : f32 to vector<8x1xf32>
    %95 = arith.mulf %93, %94 : vector<8x1xf32>
    %96 = arith.mulf %91, %91 : vector<8x128xf32>
    %cst_44 = arith.constant dense<0.000000e+00> : vector<8xf32>
    %97 = vector.multi_reduction <add>, %96, %cst_44 [1] : vector<8x128xf32> to vector<8xf32>
    %98 = vector.shape_cast %97 : vector<8xf32> to vector<8x1xf32>
    %cst_45 = arith.constant 3.125000e-02 : f32
    %99 = vector.broadcast %cst_45 : f32 to vector<8x1xf32>
    %100 = arith.mulf %98, %99 : vector<8x1xf32>
    %101 = arith.mulf %95, %95 : vector<8x1xf32>
    %102 = arith.subf %100, %101 : vector<8x1xf32>
    %103 = vector.broadcast %95 : vector<8x1xf32> to vector<8x128xf32>
    %104 = arith.subf %91, %103 : vector<8x128xf32>
    %cst_46 = arith.constant 9.99999974E-6 : f32
    %105 = vector.broadcast %cst_46 : f32 to vector<8x1xf32>
    %106 = arith.addf %102, %105 : vector<8x1xf32>
    %107 = math.rsqrt %106 : vector<8x1xf32>
    %108 = vector.broadcast %107 : vector<8x1xf32> to vector<8x128xf32>
    %109 = arith.mulf %104, %108 : vector<8x128xf32>
    %c9 = arith.constant 9 : index
    %c0_47 = arith.constant 0 : index
    %110 = vector.load %arg11[%c9, %c0_47] : memref<24x128xf32, #tpu.memory_space<vmem>>, vector<1x128xf32>
    %111 = vector.broadcast %110 : vector<1x128xf32> to vector<8x128xf32>
    %112 = arith.mulf %109, %111 : vector<8x128xf32>
    %c10 = arith.constant 10 : index
    %c0_48 = arith.constant 0 : index
    %113 = vector.load %arg11[%c10, %c0_48] : memref<24x128xf32, #tpu.memory_space<vmem>>, vector<1x128xf32>
    %114 = vector.broadcast %113 : vector<1x128xf32> to vector<8x128xf32>
    %115 = arith.addf %112, %114 : vector<8x128xf32>
    %cst_49 = arith.constant 0.000000e+00 : f32
    %116 = vector.broadcast %cst_49 : f32 to vector<8x128xf32>
    %117 = arith.maximumf %115, %116 : vector<8x128xf32>
    %118 = arith.truncf %117 : vector<8x128xf32> to vector<8x128xbf16>
    %c0_50 = arith.constant 0 : index
    %c0_51 = arith.constant 0 : index
    %119 = vector.load %arg7[%c0_50, %c0_51] : memref<128x128xbf16, #tpu.memory_space<vmem>>, vector<128x128xbf16>
    %cst_52 = arith.constant dense<0.000000e+00> : vector<8x128xf32>
    %120 = tpu.matmul %118, %119, %cst_52 {dimension_numbers = #tpu.dot_dimension_numbers<[1], [0], [0], [1], [0, 0, 1, 1], [], []>} : vector<8x128xbf16>, vector<128x128xbf16>, vector<8x128xf32> -> vector<8x128xf32>
    %c11 = arith.constant 11 : index
    %c0_53 = arith.constant 0 : index
    %121 = vector.load %arg11[%c11, %c0_53] : memref<24x128xf32, #tpu.memory_space<vmem>>, vector<1x128xf32>
    %122 = vector.broadcast %121 : vector<1x128xf32> to vector<8x128xf32>
    %123 = arith.addf %120, %122 : vector<8x128xf32>
    %cst_54 = arith.constant dense<0.000000e+00> : vector<8xf32>
    %124 = vector.multi_reduction <add>, %123, %cst_54 [1] : vector<8x128xf32> to vector<8xf32>
    %125 = vector.shape_cast %124 : vector<8xf32> to vector<8x1xf32>
    %cst_55 = arith.constant 3.125000e-02 : f32
    %126 = vector.broadcast %cst_55 : f32 to vector<8x1xf32>
    %127 = arith.mulf %125, %126 : vector<8x1xf32>
    %128 = arith.mulf %123, %123 : vector<8x128xf32>
    %cst_56 = arith.constant dense<0.000000e+00> : vector<8xf32>
    %129 = vector.multi_reduction <add>, %128, %cst_56 [1] : vector<8x128xf32> to vector<8xf32>
    %130 = vector.shape_cast %129 : vector<8xf32> to vector<8x1xf32>
    %cst_57 = arith.constant 3.125000e-02 : f32
    %131 = vector.broadcast %cst_57 : f32 to vector<8x1xf32>
    %132 = arith.mulf %130, %131 : vector<8x1xf32>
    %133 = arith.mulf %127, %127 : vector<8x1xf32>
    %134 = arith.subf %132, %133 : vector<8x1xf32>
    %135 = vector.broadcast %127 : vector<8x1xf32> to vector<8x128xf32>
    %136 = arith.subf %123, %135 : vector<8x128xf32>
    %cst_58 = arith.constant 9.99999974E-6 : f32
    %137 = vector.broadcast %cst_58 : f32 to vector<8x1xf32>
    %138 = arith.addf %134, %137 : vector<8x1xf32>
    %139 = math.rsqrt %138 : vector<8x1xf32>
    %140 = vector.broadcast %139 : vector<8x1xf32> to vector<8x128xf32>
    %141 = arith.mulf %136, %140 : vector<8x128xf32>
    %c12 = arith.constant 12 : index
    %c0_59 = arith.constant 0 : index
    %142 = vector.load %arg11[%c12, %c0_59] : memref<24x128xf32, #tpu.memory_space<vmem>>, vector<1x128xf32>
    %143 = vector.broadcast %142 : vector<1x128xf32> to vector<8x128xf32>
    %144 = arith.mulf %141, %143 : vector<8x128xf32>
    %c13 = arith.constant 13 : index
    %c0_60 = arith.constant 0 : index
    %145 = vector.load %arg11[%c13, %c0_60] : memref<24x128xf32, #tpu.memory_space<vmem>>, vector<1x128xf32>
    %146 = vector.broadcast %145 : vector<1x128xf32> to vector<8x128xf32>
    %147 = arith.addf %144, %146 : vector<8x128xf32>
    %148 = arith.addf %147, %85 : vector<8x128xf32>
    %cst_61 = arith.constant 0.000000e+00 : f32
    %149 = vector.broadcast %cst_61 : f32 to vector<8x128xf32>
    %150 = arith.maximumf %148, %149 : vector<8x128xf32>
    %151 = arith.truncf %150 : vector<8x128xf32> to vector<8x128xbf16>
    %c0_62 = arith.constant 0 : index
    %c0_63 = arith.constant 0 : index
    %152 = vector.load %arg9[%c0_62, %c0_63] : memref<128x128xbf16, #tpu.memory_space<vmem>>, vector<128x128xbf16>
    %cst_64 = arith.constant dense<0.000000e+00> : vector<8x128xf32>
    %153 = tpu.matmul %151, %152, %cst_64 {dimension_numbers = #tpu.dot_dimension_numbers<[1], [0], [0], [1], [0, 0, 1, 1], [], []>} : vector<8x128xbf16>, vector<128x128xbf16>, vector<8x128xf32> -> vector<8x128xf32>
    %c15 = arith.constant 15 : index
    %c0_65 = arith.constant 0 : index
    %154 = vector.load %arg11[%c15, %c0_65] : memref<24x128xf32, #tpu.memory_space<vmem>>, vector<1x128xf32>
    %155 = vector.broadcast %154 : vector<1x128xf32> to vector<8x128xf32>
    %156 = arith.addf %153, %155 : vector<8x128xf32>
    %cst_66 = arith.constant dense<0.000000e+00> : vector<8xf32>
    %157 = vector.multi_reduction <add>, %156, %cst_66 [1] : vector<8x128xf32> to vector<8xf32>
    %158 = vector.shape_cast %157 : vector<8xf32> to vector<8x1xf32>
    %cst_67 = arith.constant 3.125000e-02 : f32
    %159 = vector.broadcast %cst_67 : f32 to vector<8x1xf32>
    %160 = arith.mulf %158, %159 : vector<8x1xf32>
    %161 = arith.mulf %156, %156 : vector<8x128xf32>
    %cst_68 = arith.constant dense<0.000000e+00> : vector<8xf32>
    %162 = vector.multi_reduction <add>, %161, %cst_68 [1] : vector<8x128xf32> to vector<8xf32>
    %163 = vector.shape_cast %162 : vector<8xf32> to vector<8x1xf32>
    %cst_69 = arith.constant 3.125000e-02 : f32
    %164 = vector.broadcast %cst_69 : f32 to vector<8x1xf32>
    %165 = arith.mulf %163, %164 : vector<8x1xf32>
    %166 = arith.mulf %160, %160 : vector<8x1xf32>
    %167 = arith.subf %165, %166 : vector<8x1xf32>
    %168 = vector.broadcast %160 : vector<8x1xf32> to vector<8x128xf32>
    %169 = arith.subf %156, %168 : vector<8x128xf32>
    %cst_70 = arith.constant 9.99999974E-6 : f32
    %170 = vector.broadcast %cst_70 : f32 to vector<8x1xf32>
    %171 = arith.addf %167, %170 : vector<8x1xf32>
    %172 = math.rsqrt %171 : vector<8x1xf32>
    %173 = vector.broadcast %172 : vector<8x1xf32> to vector<8x128xf32>
    %174 = arith.mulf %169, %173 : vector<8x128xf32>
    %c16 = arith.constant 16 : index
    %c0_71 = arith.constant 0 : index
    %175 = vector.load %arg11[%c16, %c0_71] : memref<24x128xf32, #tpu.memory_space<vmem>>, vector<1x128xf32>
    %176 = vector.broadcast %175 : vector<1x128xf32> to vector<8x128xf32>
    %177 = arith.mulf %174, %176 : vector<8x128xf32>
    %c17 = arith.constant 17 : index
    %c0_72 = arith.constant 0 : index
    %178 = vector.load %arg11[%c17, %c0_72] : memref<24x128xf32, #tpu.memory_space<vmem>>, vector<1x128xf32>
    %179 = vector.broadcast %178 : vector<1x128xf32> to vector<8x128xf32>
    %180 = arith.addf %177, %179 : vector<8x128xf32>
    %cst_73 = arith.constant 0.000000e+00 : f32
    %181 = vector.broadcast %cst_73 : f32 to vector<8x128xf32>
    %182 = arith.maximumf %180, %181 : vector<8x128xf32>
    %183 = arith.truncf %182 : vector<8x128xf32> to vector<8x128xbf16>
    %c0_74 = arith.constant 0 : index
    %c0_75 = arith.constant 0 : index
    %184 = vector.load %arg10[%c0_74, %c0_75] : memref<128x128xbf16, #tpu.memory_space<vmem>>, vector<128x128xbf16>
    %cst_76 = arith.constant dense<0.000000e+00> : vector<8x128xf32>
    %185 = tpu.matmul %183, %184, %cst_76 {dimension_numbers = #tpu.dot_dimension_numbers<[1], [0], [0], [1], [0, 0, 1, 1], [], []>} : vector<8x128xbf16>, vector<128x128xbf16>, vector<8x128xf32> -> vector<8x128xf32>
    %c18 = arith.constant 18 : index
    %c0_77 = arith.constant 0 : index
    %186 = vector.load %arg11[%c18, %c0_77] : memref<24x128xf32, #tpu.memory_space<vmem>>, vector<1x128xf32>
    %187 = vector.broadcast %186 : vector<1x128xf32> to vector<8x128xf32>
    %188 = arith.addf %185, %187 : vector<8x128xf32>
    %189 = tpu.iota {dimensions = array<i32: 1>} : vector<8x128xi32>
    %c8_i32 = arith.constant 8 : i32
    %190 = vector.broadcast %c8_i32 : i32 to vector<8x128xi32>
    %191 = arith.cmpi slt, %189, %190 : vector<8x128xi32>
    %cst_78 = arith.constant -1.000000e+30 : f32
    %192 = vector.broadcast %cst_78 : f32 to vector<8x128xf32>
    %193 = arith.select %191, %188, %192 : vector<8x128xi1>, vector<8x128xf32>
    %cst_79 = arith.constant dense<0xFF800000> : vector<8xf32>
    %194 = vector.multi_reduction <maximumf>, %193, %cst_79 [1] : vector<8x128xf32> to vector<8xf32>
    %195 = vector.shape_cast %194 : vector<8xf32> to vector<8x1xf32>
    %196 = vector.broadcast %195 : vector<8x1xf32> to vector<8x128xf32>
    %197 = arith.subf %193, %196 : vector<8x128xf32>
    %198 = math.exp %197 : vector<8x128xf32>
    %cst_80 = arith.constant dense<0.000000e+00> : vector<8xf32>
    %199 = vector.multi_reduction <add>, %198, %cst_80 [1] : vector<8x128xf32> to vector<8xf32>
    %200 = vector.shape_cast %199 : vector<8xf32> to vector<8x1xf32>
    %201 = tpu.reciprocal %200 {approx = true} : vector<8x1xf32> -> vector<8x1xf32>
    %202 = vector.broadcast %201 : vector<8x1xf32> to vector<8x128xf32>
    %203 = arith.mulf %198, %202 : vector<8x128xf32>
    %c0_81 = arith.constant 0 : index
    %c0_82 = arith.constant 0 : index
    %204 = vector.load %arg12[%c0_81, %c0_82] : memref<8x128xf32, #tpu.memory_space<vmem>>, vector<8x128xf32>
    tpu.vector_store %arg12[%c0_81, %c0_82], %203 {strides = array<i32>} : memref<8x128xf32, #tpu.memory_space<vmem>>, vector<8x128xf32>,
    return
  }
  func.func @transform_0(%arg0: i32) -> (i32, i32) {
    %c0_i32 = arith.constant 0 : i32
    %c0_i32_0 = arith.constant 0 : i32
    return %arg0, %c0_i32 : i32, i32
  }
  func.func @transform_1(%arg0: i32) -> (i32, i32) {
    %c0_i32 = arith.constant 0 : i32
    %c0_i32_0 = arith.constant 0 : i32
    %c0_i32_1 = arith.constant 0 : i32
    return %c0_i32, %c0_i32_0 : i32, i32
  }
  func.func @transform_2(%arg0: i32) -> (i32, i32) {
    %c0_i32 = arith.constant 0 : i32
    %c0_i32_0 = arith.constant 0 : i32
    %c0_i32_1 = arith.constant 0 : i32
    return %c0_i32, %c0_i32_0 : i32, i32
  }
  func.func @transform_3(%arg0: i32) -> (i32, i32) {
    %c0_i32 = arith.constant 0 : i32
    %c0_i32_0 = arith.constant 0 : i32
    %c0_i32_1 = arith.constant 0 : i32
    return %c0_i32, %c0_i32_0 : i32, i32
  }
  func.func @transform_4(%arg0: i32) -> (i32, i32) {
    %c0_i32 = arith.constant 0 : i32
    %c0_i32_0 = arith.constant 0 : i32
    %c0_i32_1 = arith.constant 0 : i32
    return %c0_i32, %c0_i32_0 : i32, i32
  }
  func.func @transform_5(%arg0: i32) -> (i32, i32) {
    %c0_i32 = arith.constant 0 : i32
    %c0_i32_0 = arith.constant 0 : i32
    %c0_i32_1 = arith.constant 0 : i32
    return %c0_i32, %c0_i32_0 : i32, i32
  }
  func.func @transform_6(%arg0: i32) -> (i32, i32) {
    %c0_i32 = arith.constant 0 : i32
    %c0_i32_0 = arith.constant 0 : i32
    %c0_i32_1 = arith.constant 0 : i32
    return %c0_i32, %c0_i32_0 : i32, i32
  }
  func.func @transform_7(%arg0: i32) -> (i32, i32) {
    %c0_i32 = arith.constant 0 : i32
    %c0_i32_0 = arith.constant 0 : i32
    %c0_i32_1 = arith.constant 0 : i32
    return %c0_i32, %c0_i32_0 : i32, i32
  }
  func.func @transform_8(%arg0: i32) -> (i32, i32) {
    %c0_i32 = arith.constant 0 : i32
    %c0_i32_0 = arith.constant 0 : i32
    %c0_i32_1 = arith.constant 0 : i32
    return %c0_i32, %c0_i32_0 : i32, i32
  }
  func.func @transform_9(%arg0: i32) -> (i32, i32) {
    %c0_i32 = arith.constant 0 : i32
    %c0_i32_0 = arith.constant 0 : i32
    %c0_i32_1 = arith.constant 0 : i32
    return %c0_i32, %c0_i32_0 : i32, i32
  }
  func.func @transform_10(%arg0: i32) -> (i32, i32) {
    %c0_i32 = arith.constant 0 : i32
    %c0_i32_0 = arith.constant 0 : i32
    %c0_i32_1 = arith.constant 0 : i32
    return %c0_i32, %c0_i32_0 : i32, i32
  }
  func.func @transform_11(%arg0: i32) -> (i32, i32) {
    %c0_i32 = arith.constant 0 : i32
    %c0_i32_0 = arith.constant 0 : i32
    return %arg0, %c0_i32 : i32, i32
  }
}

</mosaic_0001>

<bundles_post_ra>
// kernel: tpu_custom_call.1
= control target key start
LH: loop header
LB: loop body
LE: loop exit
PB: predicated region body
PF: predicated region fallthrough
CT: control target
= control target key end

     0   :  { %s2948_s0 = inlined_call_operand.hbm [shape: f32[16,128], index: 0, kind: input, shape index: {}]   ;;  %s2949_s1 = inlined_call_operand.hbm [shape: bf16[128,128], index: 1, kind: input, shape index: {}]   ;;  %s2950_s2 = inlined_call_operand.hbm [shape: bf16[128,128], index: 2, kind: input, shape index: {}]   ;;  %s2951_s3 = inlined_call_operand.hbm [shape: bf16[128,128], index: 3, kind: input, shape index: {}]   ;;  %s2952_s4 = inlined_call_operand.hbm [shape: bf16[128,128], index: 4, kind: input, shape index: {}]   ;;  %s2953_s5 = inlined_call_operand.hbm [shape: bf16[128,128], index: 5, kind: input, shape index: {}]   ;;  %s2954_s6 = inlined_call_operand.hbm [shape: bf16[128,128], index: 6, kind: input, shape index: {}]   ;;  %s2955_s7 = inlined_call_operand.hbm [shape: bf16[128,128], index: 7, kind: input, shape index: {}]   ;;  %s2956_s8 = inlined_call_operand.hbm [shape: bf16[128,128], index: 8, kind: input, shape index: {}]   ;;  %s2957_s9 = inlined_call_operand.hbm [shape: bf16[128,128], index: 9, kind: input, shape index: {}]   ;;  %s2958_s10 = inlined_call_operand.hbm [shape: f32[24,128], index: 10, kind: input, shape index: {}]   ;;  %s2959_s11 = inlined_call_operand.hbm [shape: f32[16,128], index: 11, kind: output, shape index: {}]  }
   0x1   :  { %2960 = sst [smem:[#allocation28_spill]] %s2949_s1 }
   0x2   :  { %2961 = sst [smem:[#allocation29_spill]] %s2950_s2 }
   0x3   :  { %2962 = sst [smem:[#allocation30_spill]] %s2951_s3 }
   0x4   :  { %2963 = sst [smem:[#allocation31_spill]] %s2952_s4 }
   0x5   :  { %2964 = sst [smem:[#allocation32_spill]] %s2953_s5 }
   0x6   :  { %2965 = sst [smem:[#allocation33_spill]] %s2954_s6 }
   0x7   :  { %16 = vsyncpa [#allocation3], 0 }
   0x8   :  { %18 = vsyncpa [#allocation3 + $0x1], 0 }
   0x9   :  { %19 = vsyncpa [#allocation6], 0 }
   0xa   :  { %20 = vsyncpa [#allocation9], 0 }
   0xb   :  { %21 = vsyncpa [#allocation12], 0 }
   0xc   :  { %22 = vsyncpa [#allocation15], 0 }
   0xd   :  { %23 = vsyncpa [#allocation18], 0 }
   0xe   :  { %24 = vsyncpa [#allocation4], 0 }
   0xf   :  { %26 = vsyncpa [#allocation4 + $0x1], 0  ;;  %s2699_s17 = smov 0   ;;  %s2701_s18 = smov 0  }
  0x10   :  { %s2703_s19 = smov 0   ;;  %s2705_s20 = smov 0  }
  0x11 LB: > { %s2966_s1 = sld [smem:[#allocation28_spill]]  ;;  %s2723_s24 = sadd.s32 4294967295, %s2623_s20   ;;  %s2623_s20 = sphi %s2705_s20, %s2983_s20   ;;  %s2619_s19 = sphi %s2703_s19, %s2982_s19   ;;  %s2615_s18 = sphi %s2701_s18, %s2981_s18   ;;  %s2611_s17 = sphi %s2699_s17, %s2980_s17  }
  0x12   : > { %p1632_p0 = scmp.ge.s32.totalorder %s2623_s20, 1  ;;  %p53_p1 = scmp.eq.s32.totalorder %s2723_s24, 0 }
  0x13   : > { %p299_p2 = scmp.lt.s32.totalorder %s2623_s20, 3  ;;  %s2625_s26 = smov [#allocation5]  }
  0x14   : > { %s312_s27 = sshll.u32 %s2625_s26, 4  ;;  %s2968_s3 = sld [smem:[#allocation30_spill]]  ;;  %s313_s27 = int_to_ptr.vmem [resolvable:$true] %s312_s27 }
  0x15   : > { %p2728_p3 = pnand %p1632_p0, %p299_p2  ;;  %s2970_s5 = sld [smem:[#allocation32_spill]] }
  0x16   : > { %s2626_s16 = smov [#allocation8]   ;;  %s2627_s22 = smov 64  }
  0x17   : > { %s310_s23 = sshll.u32 %s2966_s1, 4  ;;  %p2067_p4 = pneg %p2728_p3  ;;  %s311_s23 = int_to_ptr.hbm [resolvable:$true] %s310_s23 }
  0x18   : > { %s340_s21 = sshll.u32 %s2626_s16, 4  ;;  %s2628_s26 = smov 4   ;;  %s341_s21 = int_to_ptr.vmem [resolvable:$true] %s340_s21 }
  0x19   : > { %p2740_p6 = pnand %p2067_p4, %p53_p1  ;;  %s394_s13 = sshll.u32 %s2955_s7, 4  ;;  %s395_s13 = int_to_ptr.hbm [resolvable:$true] %s394_s13 }
  0x1a   : > { %s338_s30 = sshll.u32 %s2968_s3, 4  ;;  %s2629_s14 = smov [#allocation11]   ;;  %s339_s30 = int_to_ptr.hbm [resolvable:$true] %s338_s30 }
  0x1b   : > { %s366_s15 = sshll.u32 %s2970_s5, 4  ;;  %s368_s16 = sshll.u32 %s2629_s14, 4  ;;  %s367_s15 = int_to_ptr.hbm [resolvable:$true] %s366_s15  ;;  %s369_s16 = int_to_ptr.vmem [resolvable:$true] %s368_s16 }
  0x1c   : > { %2070 = dma.hbm_to_vmem [thread:$0]  (!%p2740_p6), %s311_s23, 1024, %s313_s27, [#allocation6], %s2627_s22, %s2627_s22, %s2628_s26  }
  0x1d   : > { %2076 = dma.hbm_to_vmem [thread:$0]  (!%p2740_p6), %s339_s30, 1024, %s341_s21, [#allocation9], %s2627_s22, %s2627_s22, %s2628_s26  }
  0x1e   : > { %2082 = dma.hbm_to_vmem [thread:$0]  (!%p2740_p6), %s367_s15, 1024, %s369_s16, [#allocation12], %s2627_s22, %s2627_s22, %s2628_s26  }
  0x1f   : > { %s2630_s23 = smov [#allocation14]   ;;  %s422_s30 = sshll.u32 %s2957_s9, 4  ;;  %s423_s30 = int_to_ptr.hbm [resolvable:$true] %s422_s30 }
  0x20   : > { %s396_s27 = sshll.u32 %s2630_s23, 4  ;;  %s2971_s2 = sld [smem:[#allocation29_spill]]  ;;  %s397_s27 = int_to_ptr.vmem [resolvable:$true] %s396_s27 }
  0x21   : > { %2088 = dma.hbm_to_vmem [thread:$0]  (!%p2740_p6), %s395_s13, 1024, %s397_s27, [#allocation15], %s2627_s22, %s2627_s22, %s2628_s26  }
  0x22   : > { %s2631_s14 = smov [#allocation17]   ;;  %s2632_s1 = smov [#allocation7]  }
  0x23   : > { %s424_s15 = sshll.u32 %s2631_s14, 4  ;;  %s326_s3 = sshll.u32 %s2632_s1, 4  ;;  %s425_s15 = int_to_ptr.vmem [resolvable:$true] %s424_s15  ;;  %s327_s3 = int_to_ptr.vmem [resolvable:$true] %s326_s3 }
  0x24   : > { %2094 = dma.hbm_to_vmem [thread:$0]  (!%p2740_p6), %s423_s30, 1024, %s425_s15, [#allocation18], %s2627_s22, %s2627_s22, %s2628_s26  }
  0x25   : > { %s2972_s4 = sld [smem:[#allocation31_spill]]  ;;  %s2633_s14 = smov [#allocation10]  }
  0x26   : > { %s324_s29 = sshll.u32 %s2971_s2, 4  ;;  %s2973_s6 = sld [smem:[#allocation33_spill]]  ;;  %s325_s29 = int_to_ptr.hbm [resolvable:$true] %s324_s29 }
  0x27   : > { %2073 = dma.hbm_to_vmem [thread:$0]  (!%p2740_p6), %s325_s29, 1024, %s327_s3, [#allocation6], %s2627_s22, %s2627_s22, %s2628_s26  }
  0x28   : > { %s354_s30 = sshll.u32 %s2633_s14, 4  ;;  %s2634_s15 = smov [#allocation13]   ;;  %s355_s30 = int_to_ptr.vmem [resolvable:$true] %s354_s30 }
  0x29   : > { %s382_s1 = sshll.u32 %s2634_s15, 4  ;;  %s408_s29 = sshll.u32 %s2956_s8, 4  ;;  %s383_s1 = int_to_ptr.vmem [resolvable:$true] %s382_s1  ;;  %s409_s29 = int_to_ptr.hbm [resolvable:$true] %s408_s29 }
  0x2a   : > { %s2635_s21 = smov [#allocation16]   ;;  %s2637_s15 = smov 128  }
  0x2b   : > { %s352_s13 = sshll.u32 %s2972_s4, 4  ;;  %s410_s14 = sshll.u32 %s2635_s21, 4  ;;  %s353_s13 = int_to_ptr.hbm [resolvable:$true] %s352_s13  ;;  %s411_s14 = int_to_ptr.vmem [resolvable:$true] %s410_s14 }
  0x2c   : > { %s380_s28 = sshll.u32 %s2973_s6, 4  ;;  %s1631_s16 = sadd.s32 4294967294, %s2623_s20   ;;  %s381_s28 = int_to_ptr.hbm [resolvable:$true] %s380_s28 }
  0x2d   : > { %2079 = dma.hbm_to_vmem [thread:$0]  (!%p2740_p6), %s353_s13, 1024, %s355_s30, [#allocation9], %s2627_s22, %s2627_s22, %s2628_s26  }
  0x2e   : > { %2085 = dma.hbm_to_vmem [thread:$0]  (!%p2740_p6), %s381_s28, 1024, %s383_s1, [#allocation12], %s2627_s22, %s2627_s22, %s2628_s26  }
  0x2f   : > { %s436_s13 = sshll.u32 %s2958_s10, 4  ;;  %s2636_s28 = smov [#allocation19]   ;;  %s437_s13 = int_to_ptr.hbm [resolvable:$true] %s436_s13 }
  0x30   : > { %2091 = dma.hbm_to_vmem [thread:$0]  (!%p2740_p6), %s409_s29, 1024, %s411_s14, [#allocation15], %s2627_s22, %s2627_s22, %s2628_s26  }
  0x31   : > { %s438_s30 = sshll.u32 %s2636_s28, 4  ;;  %s2638_s1 = smov 8   ;;  %s439_s30 = int_to_ptr.vmem [resolvable:$true] %s438_s30 }
  0x32   : > { %2097 = dma.hbm_to_vmem [thread:$0]  (!%p2740_p6), %s437_s13, 384, %s439_s30, [#allocation18], %s2637_s15, %s2637_s15, %s2638_s1  }
  0x33   : > { %s2817_s23 = sadd.s32 1, %s2623_s20   ;;  %s39_s27 = sadd.s32 1, %s2619_s19 }
  0x34   : > { %s36_s3 = ssub.s32 %s2623_s20, %s2817_s23  ;;  %p46_p8 = scmp.ne.s32.totalorder %s2619_s19, %s2615_s18 }
  0x35   : > { %p37_p7 = scmp.eq.s32.totalorder %s36_s3, 0  ;;  %p47_p9 = scmp.eq.s32.totalorder %s2623_s20, 0 }
  0x36   : > { %p52_p10 = scmp.ne.s32.totalorder %s2615_s18, %s2611_s17  ;;  %p286_p13 = scmp.eq.s32.totalorder %s2723_s24, 1 }
  0x37   : > { %s2828_s22 = scalar_select %p37_p7, %s2619_s19, %s39_s27  }
  0x38   : > { %p2830_p11 = por %p47_p9, %p46_p8  ;;  %p2836_p12 = por %p53_p1, %p52_p10 }
  0x39   : > { %p292_p0 = scmp.eq.s32.totalorder %s1631_s16, 1  ;;  %p2116_p2 = scmp.lt.s32.totalorder %s2623_s20, 2 }
  0x3a   : > { %s452_s29 = sand.u32 1, %s2619_s19   ;;  %p2843_p4 = por %p286_p13, %p46_p8 }
  0x3b   : > { %p2847_p6 = por %p292_p0, %p52_p10  ;;  %s1644_s14 = sshll.u32 %s452_s29, 3 }
  0x3c   : > { %s1645_s28 = sshll.u32 %s2623_s20, 3  ;;  %s456_s3 = scalar_lea.vmem [#allocation2], %s1644_s14 }
  0x3d   : > { %s460_s1 = scalar_lea.hbm %s2948_s0, %s1645_s28  ;;  %s464_s27 = sshll.u32 %s456_s3, 4  ;;  %s465_s27 = int_to_ptr.vmem [resolvable:$true] %s464_s27 }
  0x3e   : > { %s462_s2 = sshll.u32 %s460_s1, 4  ;;  %p2857_p7 = pnand %p2116_p2, %p2830_p11  ;;  %s463_s2 = int_to_ptr.hbm [resolvable:$true] %s462_s2 }
  0x3f   : > { %s453_s4 = scalar_lea.sflag [#allocation3], %s452_s29  ;;  %s2507_s5 = sshra.s32 %s463_s2, 4  ;;  %s2508_s5 = int_to_ptr.hbm [resolvable:$true] %s2507_s5 }
  0x40   : > { %s2509_s6 = scalar_lea.hbm %s2508_s5, 8  ;;  %p2511_p9 = pneg %p2857_p7 }
  0x41   : > { %p2510_p8 = scmp.ne.s32.totalorder %s2508_s5, %s2509_s6  ;;  %s2514_s30 = scalar_lea.hbm %s2948_s0, 16 }
  0x42   : > { %p2515_p11 = scmp.lt.s32.totalorder %s2508_s5, %s2948_s0  ;;  %p2516_p0 = scmp.lt.s32.totalorder %s2514_s30, %s2509_s6 }
  0x43   : > { %p2512_p10 = pnand %p2511_p9, %p2510_p8 }
  0x44   : > { %p2517_p2 = por %p2516_p0, %p2515_p11 }
  0x45   : > { %p2513_p13 = pneg %p2512_p10 }
  0x47   : > { %p2518_p5 = pnand %p2517_p2, %p2513_p13 }
  0x49   : > { %2521 = shalt.err (!%p2518_p5)
}
  0x4a   : > { %2101 = dma.hbm_to_vmem [thread:$0]  (!%p2857_p7), %s463_s2, 128, %s465_s27, %s453_s4  }
  0x4b   : > { %473 = sbr.rel (%p2728_p3) target bundleno = 2085 (0x825), region = 64  ;;  %s2874_s29 = sand.u32 (!%p2728_p3), 1, %s2615_s18  }
  0x4c   : > { %s1647_s1 = sshll.u32 (!%p2728_p3), %s2874_s29, 3  ;;  %s476_s3 = scalar_lea.sflag (!%p2728_p3), [#allocation3], %s2874_s29 }
  0x4d   : > { %s2880_s5 = scalar_lea.vmem (!%p2728_p3), [#allocation2], %s1647_s1 }
  0x50   : > { %2582 = dma.done.wait (%p2836_p12), %s476_s3, 128  }
  0x51   : > { %2584 = vsyncadd (%p2836_p12), %s476_s3, 4294967168 }
  0x52   : > { %2586 = dma.done.wait (%p53_p1), [#allocation6], 2048  }
  0x53   : > { %2588 = vsyncadd (%p53_p1), [#allocation6], 4294965248 }
  0x54   : > { %2590 = dma.done.wait (%p53_p1), [#allocation9], 2048  }
  0x55   : > { %2592 = vsyncadd (%p53_p1), [#allocation9], 4294965248 }
  0x56   : > { %2594 = dma.done.wait (%p53_p1), [#allocation12], 2048  }
  0x57   : > { %2596 = vsyncadd (%p53_p1), [#allocation12], 4294965248 }
  0x58   : > { %2598 = dma.done.wait (%p53_p1), [#allocation15], 2048  }
  0x59   : > { %2600 = vsyncadd (%p53_p1), [#allocation15], 4294965248 }
  0x5a   : > { %2602 = dma.done.wait (%p53_p1), [#allocation18], 1408  }
  0x5b   : > { %2604 = vsyncadd (%p53_p1), [#allocation18], 4294965888  ;;  %v1958_v0 = vld [vmem:[#allocation5 + $0x38] sm:$0xff]  ;;  %v1957_v1 = vld [vmem:[#allocation5 + $0x30] sm:$0xff]  ;;  %s1948_s2 = sshll.u32 %s2723_s24, 3  ;;  %s568_s12 = scalar_lea.vmem [#allocation20], %s1647_s1 }
  0x5c   : > { %637 = vmatpush.bf16.msra.mxu0 %v1958_v0  ;;  %v1966_v2 = vld [vmem:[#allocation10 + $0x38] sm:$0xff]  ;;  %v1965_v4 = vld [vmem:[#allocation10 + $0x30] sm:$0xff]  ;;  %v1956_v6 = vld [vmem:[#allocation5 + $0x28] sm:$0xff]  ;;  %s1461_s25 = scalar_lea.hbm %s2959_s11, %s1948_s2  ;;  %s1463_s27 = sshll.u32 %s568_s12, 4  ;;  %s1464_s27 = int_to_ptr.vmem [resolvable:$true] %s1463_s27 }
  0x5d   : > { %v1974_v3 = vld [vmem:[#allocation7 + $0x38] sm:$0xff]  ;;  %718 = vmatpush.bf16.msra.mxu1 %v1966_v2  ;;  %v1973_v5 = vld [vmem:[#allocation7 + $0x30] sm:$0xff]  ;;  %v1964_v7 = vld [vmem:[#allocation10 + $0x28] sm:$0xff]  ;;  %s1465_s16 = sshll.u32 %s1461_s25, 4  ;;  %s1451_s14 = scalar_lea.sflag [#allocation4], %s2874_s29  ;;  %s1466_s16 = int_to_ptr.hbm [resolvable:$true] %s1465_s16 }
  0x5e   : > { %797 = vmatpush.bf16.msra.mxu2 %v1974_v3  ;;  %v1972_v8 = vld [vmem:[#allocation7 + $0x28] sm:$0xff]  ;;  %v1955_v9 = vld [vmem:[#allocation5 + $0x20] sm:$0xff]  ;;  %v1954_v12 = vld [vmem:[#allocation5 + $0x18] sm:$0xff]  ;;  %s2551_s28 = sshra.s32 %s1466_s16, 4  ;;  %s2557_s26 = scalar_lea.hbm %s2959_s11, 16  ;;  %s2552_s28 = int_to_ptr.hbm [resolvable:$true] %s2551_s28 }
  0x5f   : > { %v1963_v10 = vld [vmem:[#allocation10 + $0x20] sm:$0xff]  ;;  %v1962_v13 = vld [vmem:[#allocation10 + $0x18] sm:$0xff]  ;;  %v1953_v15 = vld [vmem:[#allocation5 + $0x10] sm:$0xff]  ;;  %s2553_s24 = scalar_lea.hbm %s2552_s28, 8  ;;  %p2558_p12 = scmp.lt.s32.totalorder %s2552_s28, %s2959_s11 }
  0x60   : > { %638 = vmatpush.bf16.msra.mxu0 %v1957_v1  ;;  %v1971_v11 = vld [vmem:[#allocation7 + $0x20] sm:$0xff]  ;;  %v1970_v14 = vld [vmem:[#allocation7 + $0x18] sm:$0xff]  ;;  %v1961_v16 = vld [vmem:[#allocation10 + $0x10] sm:$0xff]  ;;  %p2554_p1 = scmp.ne.s32.totalorder %s2552_s28, %s2553_s24  ;;  %p2559_p7 = scmp.lt.s32.totalorder %s2557_s26, %s2553_s24 }
  0x61   : > { %719 = vmatpush.bf16.msra.mxu1 %v1965_v4  ;;  %v1969_v17 = vld [vmem:[#allocation7 + $0x10] sm:$0xff]  ;;  %v1952_v18 = vld [vmem:[#allocation5 + $0x8] sm:$0xff]  ;;  %v1951_v19 = vld [vmem:[#allocation5] sm:$0xff] }
  0x62   : > { %798 = vmatpush.bf16.msra.mxu2 %v1973_v5  ;;  %v569_v20 = vld [vmem:[%s2880_s5] sm:$0xff]  ;;  %v1960_v22 = vld [vmem:[#allocation10 + $0x8] sm:$0xff]  ;;  %v1959_v24 = vld [vmem:[#allocation10] sm:$0xff]  ;;  %p2555_p3 = pnand %p2554_p1, %p2843_p4  ;;  %p2560_p8 = por %p2559_p7, %p2558_p12 }
  0x63   : > { %v570_v21 = vpack.c.bf16 %v569_v20, %v569_v20  ;;  %v1968_v23 = vld [vmem:[#allocation7 + $0x8] sm:$0xff]  ;;  %v1967_v25 = vld [vmem:[#allocation7] sm:$0xff]  ;;  %v1982_v39 = vld [vmem:[#allocation8 + $0x38] sm:$0xff] }
  0x64   : > { %639 = vmatpush.bf16.msra.mxu0 %v1956_v6  ;;  %v2174_v26 = vld [vmem:[#allocation19] ss:$0 sm:$0xff]  ;;  %v2176_v33 = vld [vmem:[#allocation19 + $0x1] ss:$0 sm:$0xff]  ;;  %906 = vmatpush.bf16.msra.mxu3 %v1982_v39  ;;  %v1981_v40 = vld [vmem:[#allocation8 + $0x30] sm:$0xff]  ;;  %p2556_p5 = pneg %p2555_p3 }
  0x65   : > { %720 = vmatpush.bf16.msra.mxu1 %v1964_v7  ;;  %v1980_v41 = vld [vmem:[#allocation8 + $0x28] sm:$0xff]  ;;  %v1979_v42 = vld [vmem:[#allocation8 + $0x20] sm:$0xff]  ;;  %v1978_v43 = vld [vmem:[#allocation8 + $0x18] sm:$0xff] }
  0x66   : > { %799 = vmatpush.bf16.msra.mxu2 %v1972_v8  ;;  %v1977_v44 = vld [vmem:[#allocation8 + $0x10] sm:$0xff]  ;;  %v1976_v46 = vld [vmem:[#allocation8 + $0x8] sm:$0xff]  ;;  %v1975_v47 = vld [vmem:[#allocation8] sm:$0xff]  ;;  %p2561_p9 = pnand %p2560_p8, %p2556_p5 }
  0x67   : > { %v2177_v61 = vld [vmem:[#allocation19 + $0x2] ss:$0 sm:$0xff]  ;;  %v2178_v0 = vld [vmem:[#allocation19 + $0x3] ss:$0 sm:$0xff]  ;;  %v2179_v5 = vld [vmem:[#allocation19 + $0x4] ss:$0 sm:$0xff] }
  0x68   : > { %640 = vmatpush.bf16.msra.mxu0 %v1955_v9  ;;  %907 = vmatpush.bf16.msra.mxu3 %v1981_v40 }
  0x69   : > { %721 = vmatpush.bf16.msra.mxu1 %v1963_v10  ;;  %v1990_v10 = vld [vmem:[#allocation14 + $0x38] sm:$0xff] }
  0x6a   : > { %800 = vmatpush.bf16.msra.mxu2 %v1971_v11  ;;  %v1998_v11 = vld [vmem:[#allocation11 + $0x38] sm:$0xff] }
  0x6c   : > { %641 = vmatpush.bf16.msra.mxu0 %v1954_v12  ;;  %908 = vmatpush.bf16.msra.mxu3 %v1980_v41  ;;  %v1989_v12 = vld [vmem:[#allocation14 + $0x30] sm:$0xff]  ;;  %v2180_v41 = vld [vmem:[#allocation19 + $0x5] ss:$0 sm:$0xff] }
  0x6d   : > { %722 = vmatpush.bf16.msra.mxu1 %v1962_v13  ;;  %v1997_v13 = vld [vmem:[#allocation11 + $0x30] sm:$0xff] }
  0x6e   : > { %801 = vmatpush.bf16.msra.mxu2 %v1970_v14  ;;  %v1988_v14 = vld [vmem:[#allocation14 + $0x28] sm:$0xff] }
  0x70   : > { %642 = vmatpush.bf16.msra.mxu0 %v1953_v15  ;;  %909 = vmatpush.bf16.msra.mxu3 %v1979_v42  ;;  %v1996_v15 = vld [vmem:[#allocation11 + $0x28] sm:$0xff] }
  0x71   : > { %723 = vmatpush.bf16.msra.mxu1 %v1961_v16  ;;  %v1987_v16 = vld [vmem:[#allocation14 + $0x20] sm:$0xff] }
  0x72   : > { %802 = vmatpush.bf16.msra.mxu2 %v1969_v17  ;;  %v1995_v17 = vld [vmem:[#allocation11 + $0x20] sm:$0xff] }
  0x74   : > { %643 = vmatpush.bf16.msra.mxu0 %v1952_v18  ;;  %910 = vmatpush.bf16.msra.mxu3 %v1978_v43  ;;  %v1986_v18 = vld [vmem:[#allocation14 + $0x18] sm:$0xff]  ;;  %v2175_v43 = vld [vmem:[#allocation19 + $0x7] ss:$0 sm:$0xff] }
  0x75   : > { %724 = vmatpush.bf16.msra.mxu1 %v1960_v22  ;;  %v1993_v22 = vld [vmem:[#allocation11 + $0x10] sm:$0xff] }
  0x76   : > { %803 = vmatpush.bf16.msra.mxu2 %v1968_v23  ;;  %v1984_v23 = vld [vmem:[#allocation14 + $0x8] sm:$0xff] }
  0x78   : > { %644 = vmatpush.bf16.msra.mxu0 %v1951_v19  ;;  %911 = vmatpush.bf16.msra.mxu3 %v1977_v44  ;;  %v1994_v19 = vld [vmem:[#allocation11 + $0x18] sm:$0xff] }
  0x79   : > { %725 = vmatpush.bf16.msra.mxu1 %v1959_v24  ;;  %v1992_v24 = vld [vmem:[#allocation11 + $0x8] sm:$0xff] }
  0x7a   : > { %804 = vmatpush.bf16.msra.mxu2 %v1967_v25 }
  0x7b   : > { %645 = vmatmul.bf16.vlgmr.msra.gmra.mxu0 %v570_v21  ;;  %v1985_v21 = vld [vmem:[#allocation14 + $0x10] sm:$0xff] }
  0x7c   : > { %912 = vmatpush.bf16.msra.mxu3 %v1976_v46  ;;  %1016 = vmatpush.bf16.msrb.mxu0 %v1990_v10 }
  0x7d   : > { %1095 = vmatpush.bf16.msrb.mxu1 %v1998_v11 }
  0x80   : > { %913 = vmatpush.bf16.msra.mxu3 %v1975_v47  ;;  %1017 = vmatpush.bf16.msrb.mxu0 %v1989_v12 }
  0x81   : > { %1096 = vmatpush.bf16.msrb.mxu1 %v1997_v13 }
  0x84   : > { %1018 = vmatpush.bf16.msrb.mxu0 %v1988_v14 }
  0x85   : > { %1097 = vmatpush.bf16.msrb.mxu1 %v1996_v15 }
  0x88   : > { %1019 = vmatpush.bf16.msrb.mxu0 %v1987_v16  ;;  %v2184_v16 = vld [vmem:[#allocation19 + $0x9] ss:$0 sm:$0xff] }
  0x89   : > { %1098 = vmatpush.bf16.msrb.mxu1 %v1995_v17 }
  0x8c   : > { %1020 = vmatpush.bf16.msrb.mxu0 %v1986_v18 }
  0x8d   : > { %1099 = vmatpush.bf16.msrb.mxu1 %v1994_v19  ;;  %v2185_v19 = vld [vmem:[#allocation19 + $0xa] ss:$0 sm:$0xff] }
  0x90   : > { %1021 = vmatpush.bf16.msrb.mxu0 %v1985_v21 }
  0x91   : > { %1100 = vmatpush.bf16.msrb.mxu1 %v1993_v22 }
  0x94   : > { %1022 = vmatpush.bf16.msrb.mxu0 %v1984_v23 }
  0x95   : > { %1101 = vmatpush.bf16.msrb.mxu1 %v1992_v24  ;;  %v2186_v24 = vld [vmem:[#allocation19 + $0xb] ss:$0 sm:$0xff] }
  0xf8   : > { %v646_v27 = vpop.f32.mrf.mxu0 }
  0xf9   : > { %v647_v28 = vadd.f32 %v2174_v26, %v646_v27  ;;  %v1983_v26 = vld [vmem:[#allocation14] sm:$0xff] }
  0xfa   : > { %v1991_v27 = vld [vmem:[#allocation11] sm:$0xff]  ;;  %1023 = vmatpush.bf16.msrb.mxu0 %v1983_v26 }
  0xfb   : > { %v650_v29 = vmax.f32 %v647_v28, 0.0  ;;  %1102 = vmatpush.bf16.msrb.mxu1 %v1991_v27 }
  0xfd   : > { %v651_v30 = vpack.c.bf16 %v650_v29, %v650_v29 }
  0xff   : > { %726 = vmatmul.bf16.vlgmr.msra.gmra.mxu1 %v651_v30  ;;  %805 = vmatmul.bf16.vlgmr.msra.gmra.mxu2 %v651_v30 }
 0x100   : > { %v648_v31 = vpop.f32.mrf.mxu0 }
 0x17c   : > { %v2907_v32 = vpop.f32.mrf.mxu1 }
 0x17d   : > { %v728_v47 = vadd.f32 %v2175_v43, %v2907_v32  ;;  %v2004_v32 = vld [vmem:[#allocation13 + $0x28] sm:$0xff] }
 0x182   : > { %v806_v34 = vpop.f32.mrf.mxu2 }
 0x183   : > { %v807_v35 = vadd.f32 %v2176_v33, %v806_v34 }
 0x184   : > { %v729_v36 = vpop.f32.mrf.mxu1 }
 0x185   : > { %810 = vadd.xlane.f32.xlu0 %v807_v35  ;;  %v813_v38 = vmul.f32 %v807_v35, %v807_v35 }
 0x18a   : > { %v808_v37 = vpop.f32.mrf.mxu2 }
 0x18d   : > { %814 = vadd.xlane.f32.xlu0 %v813_v38 }
 0x1f8   : > { %v811_v45 = vpop.xlane.xlu0 %810 }
 0x1f9   : > { %v812_v48 = vmul.f32 0.015625, %v811_v45  ;;  %v2181_v45 = vld [vmem:[#allocation19 + $0x6] ss:$0 sm:$0xff] }
 0x1fb   : > { %v817_v50 = vmul.f32 %v812_v48, %v812_v48  ;;  %v819_v60 = vsub.f32 %v807_v35, %v812_v48 }
 0x200   : > { %v815_v49 = vpop.xlane.xlu0 %814 }
 0x201   : > { %v816_v51 = vmul.f32 0.015625, %v815_v49 }
 0x203   : > { %v818_v52 = vsub.f32 %v816_v51, %v817_v50 }
 0x205   : > { %v820_v53 = vadd.f32 1e-05, %v818_v52  ;;  %v2183_v52 = vld [vmem:[#allocation19 + $0x8] ss:$0 sm:$0xff] }
 0x207   : > { %2193 = vrsqrt.f32 %v820_v53  ;;  %vm827_vm1 = vweird.f32 %v820_v53 }
 0x20d   : > { %v2194_v54 = vpop.eup %2193 }
 0x20e   : > { %v822_v55 = vmul.f32 %v2194_v54, %v820_v53  ;;  %vm828_vm0 = vweird.f32 %v2194_v54 }
 0x20f   : > { %vm829_vm2 = vmor %vm827_vm1, %vm828_vm0 }
 0x210   : > { %v823_v56 = vmul.f32 %v2194_v54, %v822_v55 }
 0x212   : > { %v824_v57 = vmul.f32 0.5, %v823_v56 }
 0x214   : > { %v825_v58 = vsub.f32 1.5, %v824_v57 }
 0x216   : > { %v826_v59 = vmul.f32 %v2194_v54, %v825_v58 }
 0x218   : > { %v830_v62 = vsel %vm829_vm2, %v2194_v54, %v826_v59  ;;  %v2006_v59 = vld [vmem:[#allocation13 + $0x38] sm:$0xff] }
 0x219   : > { %v831_v63 = vmul.f32 %v830_v62, %v819_v60  ;;  %1204 = vmatpush.bf16.msrb.mxu2 %v2006_v59  ;;  %v2005_v60 = vld [vmem:[#allocation13 + $0x30] sm:$0xff]  ;;  %v2002_v62 = vld [vmem:[#allocation13 + $0x18] sm:$0xff] }
 0x21b   : > { %v834_v1 = vmul.f32 %v2177_v61, %v831_v63  ;;  %v2003_v61 = vld [vmem:[#allocation13 + $0x20] sm:$0xff]  ;;  %v2001_v63 = vld [vmem:[#allocation13 + $0x10] sm:$0xff] }
 0x21d   : > { %v837_v2 = vadd.f32 %v2178_v0, %v834_v1  ;;  %1205 = vmatpush.bf16.msrb.mxu2 %v2005_v60  ;;  %v2000_v1 = vld [vmem:[#allocation13 + $0x8] sm:$0xff] }
 0x21f   : > { %v838_v3 = vmax.f32 %v837_v2, 0.0  ;;  %v1999_v2 = vld [vmem:[#allocation13] sm:$0xff] }
 0x221   : > { %v839_v4 = vpack.c.bf16 %v838_v3, %v838_v3  ;;  %1206 = vmatpush.bf16.msrb.mxu2 %v2004_v32 }
 0x223   : > { %914 = vmatmul.bf16.vlgmr.msra.gmra.mxu3 %v839_v4 }
 0x225   : > { %1207 = vmatpush.bf16.msrb.mxu2 %v2003_v61 }
 0x229   : > { %1208 = vmatpush.bf16.msrb.mxu2 %v2002_v62 }
 0x22d   : > { %1209 = vmatpush.bf16.msrb.mxu2 %v2001_v63  ;;  %v2189_v63 = vld [vmem:[#allocation19 + $0xf] ss:$0 sm:$0xff] }
 0x231   : > { %1210 = vmatpush.bf16.msrb.mxu2 %v2000_v1 }
 0x235   : > { %1211 = vmatpush.bf16.msrb.mxu2 %v1999_v2 }
 0x2a6   : > { %v915_v6 = vpop.f32.mrf.mxu3 }
 0x2a7   : > { %v916_v7 = vadd.f32 %v2179_v5, %v915_v6 }
 0x2a9   : > { %919 = vadd.xlane.f32.xlu1 %v916_v7  ;;  %v922_v9 = vmul.f32 %v916_v7, %v916_v7 }
 0x2ae   : > { %v917_v8 = vpop.f32.mrf.mxu3 }
 0x2b1   : > { %923 = vadd.xlane.f32.xlu1 %v922_v9 }
 0x31c   : > { %v920_v20 = vpop.xlane.xlu1 %919 }
 0x31d   : > { %v921_v25 = vmul.f32 0.015625, %v920_v20 }
 0x31f   : > { %v926_v29 = vmul.f32 %v921_v25, %v921_v25  ;;  %v928_v40 = vsub.f32 %v916_v7, %v921_v25 }
 0x324   : > { %v924_v28 = vpop.xlane.xlu1 %923 }
 0x325   : > { %v925_v30 = vmul.f32 0.015625, %v924_v28 }
 0x327   : > { %v927_v31 = vsub.f32 %v925_v30, %v926_v29  ;;  %v2014_v29 = vld [vmem:[#allocation16 + $0x38] sm:$0xff]  ;;  %v2013_v30 = vld [vmem:[#allocation16 + $0x30] sm:$0xff] }
 0x328   : > { %1314 = vmatpush.bf16.msrb.mxu3 %v2014_v29 }
 0x329   : > { %v929_v33 = vadd.f32 1e-05, %v927_v31  ;;  %v2012_v31 = vld [vmem:[#allocation16 + $0x28] sm:$0xff] }
 0x32b   : > { %2195 = vrsqrt.f32 %v929_v33  ;;  %vm936_vm4 = vweird.f32 %v929_v33 }
 0x32c   : > { %1315 = vmatpush.bf16.msrb.mxu3 %v2013_v30 }
 0x330   : > { %1316 = vmatpush.bf16.msrb.mxu3 %v2012_v31 }
 0x331   : > { %v2196_v34 = vpop.eup %2195 }
 0x332   : > { %v931_v35 = vmul.f32 %v2196_v34, %v929_v33  ;;  %vm937_vm3 = vweird.f32 %v2196_v34  ;;  %v2011_v33 = vld [vmem:[#allocation16 + $0x20] sm:$0xff] }
 0x333   : > { %vm938_vm5 = vmor %vm936_vm4, %vm937_vm3 }
 0x334   : > { %v932_v36 = vmul.f32 %v2196_v34, %v931_v35  ;;  %1317 = vmatpush.bf16.msrb.mxu3 %v2011_v33  ;;  %v2009_v35 = vld [vmem:[#allocation16 + $0x10] sm:$0xff] }
 0x336   : > { %v933_v37 = vmul.f32 0.5, %v932_v36  ;;  %v2008_v36 = vld [vmem:[#allocation16 + $0x8] sm:$0xff] }
 0x338   : > { %v934_v38 = vsub.f32 1.5, %v933_v37 }
 0x33a   : > { %v935_v39 = vmul.f32 %v2196_v34, %v934_v38  ;;  %v2007_v38 = vld [vmem:[#allocation16] sm:$0xff] }
 0x33c   : > { %v939_v42 = vsel %vm938_vm5, %v2196_v34, %v935_v39  ;;  %v2010_v34 = vld [vmem:[#allocation16 + $0x18] sm:$0xff] }
 0x33d   : > { %v940_v44 = vmul.f32 %v939_v42, %v928_v40  ;;  %1318 = vmatpush.bf16.msrb.mxu3 %v2010_v34  ;;  %v1436_v34 = vlaneseq }
 0x33f   : > { %v943_v46 = vmul.f32 %v2180_v41, %v940_v44 }
 0x341   : > { %v946_v48 = vadd.f32 %v2181_v45, %v943_v46  ;;  %1319 = vmatpush.bf16.msrb.mxu3 %v2009_v35  ;;  %v1437_v35 = vand.u32 127, %v1436_v34 }
 0x343   : > { %v947_v49 = vadd.f32 %v946_v48, %v728_v47  ;;  %vm1438_vm15 = vcmp.lt.s32.totalorder %v1437_v35, 8 }
 0x345   : > { %v948_v50 = vmax.f32 %v947_v49, 0.0  ;;  %1320 = vmatpush.bf16.msrb.mxu3 %v2008_v36  ;;  %v2192_v36 = vld [vmem:[#allocation19 + $0x12] ss:$0 sm:$0xff] }
 0x347   : > { %v949_v51 = vpack.c.bf16 %v948_v50, %v948_v50 }
 0x349   : > { %1024 = vmatmul.bf16.vlgmr.msrb.gmra.mxu0 %v949_v51  ;;  %1103 = vmatmul.bf16.vlgmr.msrb.gmra.mxu1 %v949_v51 }
 0x34a   : > { %1321 = vmatpush.bf16.msrb.mxu3 %v2007_v38 }
 0x3c6   : > { %v2910_v53 = vpop.f32.mrf.mxu0  ;;  %v1104_v54 = vpop.f32.mrf.mxu1 }
 0x3c7   : > { %v1105_v55 = vadd.f32 %v2183_v52, %v1104_v54  ;;  %v2187_v52 = vld [vmem:[#allocation19 + $0xc] ss:$0 sm:$0xff] }
 0x3c9   : > { %1108 = vadd.xlane.f32.xlu2 %v1105_v55  ;;  %v1111_v58 = vmul.f32 %v1105_v55, %v1105_v55 }
 0x3ce   : > { %v1027_v56 = vpop.f32.mrf.mxu0  ;;  %v1106_v57 = vpop.f32.mrf.mxu1 }
 0x3cf   : > { %v2188_v57 = vld [vmem:[#allocation19 + $0xd] ss:$0 sm:$0xff] }
 0x3d1   : > { %1112 = vadd.xlane.f32.xlu2 %v1111_v58 }
 0x43c   : > { %v1109_v0 = vpop.xlane.xlu2 %1108 }
 0x43d   : > { %v1110_v3 = vmul.f32 0.03125, %v1109_v0 }
 0x43f   : > { %v1115_v5 = vmul.f32 %v1110_v3, %v1110_v3  ;;  %v1117_v15 = vsub.f32 %v1105_v55, %v1110_v3  ;;  %v2182_v55 = vld [vmem:[#allocation19 + $0xe] ss:$0 sm:$0xff] }
 0x440   : > { %v1026_v59 = vadd.f32 %v2182_v55, %v2910_v53  ;;  %v2018_v53 = vld [vmem:[#allocation17 + $0x18] sm:$0xff] }
 0x444   : > { %v1113_v4 = vpop.xlane.xlu2 %1112 }
 0x445   : > { %v1114_v6 = vmul.f32 0.03125, %v1113_v4  ;;  %v2022_v4 = vld [vmem:[#allocation17 + $0x38] sm:$0xff] }
 0x446   : > { %1423 = vmatpush.bf16.msra.mxu0 %v2022_v4 }
 0x447   : > { %v1116_v7 = vsub.f32 %v1114_v6, %v1115_v5  ;;  %v2021_v5 = vld [vmem:[#allocation17 + $0x30] sm:$0xff]  ;;  %v2020_v6 = vld [vmem:[#allocation17 + $0x28] sm:$0xff] }
 0x449   : > { %v1118_v8 = vadd.f32 1e-05, %v1116_v7  ;;  %v2019_v7 = vld [vmem:[#allocation17 + $0x20] sm:$0xff] }
 0x44a   : > { %1424 = vmatpush.bf16.msra.mxu0 %v2021_v5 }
 0x44b   : > { %2197 = vrsqrt.f32 %v1118_v8  ;;  %vm1125_vm7 = vweird.f32 %v1118_v8 }
 0x44e   : > { %1425 = vmatpush.bf16.msra.mxu0 %v2020_v6 }
 0x451   : > { %v2198_v9 = vpop.eup %2197 }
 0x452   : > { %v1120_v10 = vmul.f32 %v2198_v9, %v1118_v8  ;;  %vm1126_vm6 = vweird.f32 %v2198_v9  ;;  %1426 = vmatpush.bf16.msra.mxu0 %v2019_v7  ;;  %v2017_v8 = vld [vmem:[#allocation17 + $0x10] sm:$0xff] }
 0x453   : > { %vm1127_vm8 = vmor %vm1125_vm7, %vm1126_vm6 }
 0x454   : > { %v1121_v11 = vmul.f32 %v2198_v9, %v1120_v10  ;;  %v2015_v10 = vld [vmem:[#allocation17] sm:$0xff] }
 0x456   : > { %v1122_v12 = vmul.f32 0.5, %v1121_v11  ;;  %1427 = vmatpush.bf16.msra.mxu0 %v2018_v53 }
 0x458   : > { %v1123_v13 = vsub.f32 1.5, %v1122_v12 }
 0x45a   : > { %v1124_v14 = vmul.f32 %v2198_v9, %v1123_v13  ;;  %1428 = vmatpush.bf16.msra.mxu0 %v2017_v8 }
 0x45c   : > { %v1128_v17 = vsel %vm1127_vm8, %v2198_v9, %v1124_v14  ;;  %v2016_v9 = vld [vmem:[#allocation17 + $0x8] sm:$0xff] }
 0x45d   : > { %v1129_v18 = vmul.f32 %v1128_v17, %v1117_v15 }
 0x45e   : > { %1429 = vmatpush.bf16.msra.mxu0 %v2016_v9 }
 0x45f   : > { %v1132_v20 = vmul.f32 %v2184_v16, %v1129_v18 }
 0x461   : > { %v1135_v21 = vadd.f32 %v2185_v19, %v1132_v20 }
 0x462   : > { %1430 = vmatpush.bf16.msra.mxu0 %v2015_v10 }
 0x463   : > { %v1136_v22 = vmax.f32 %v1135_v21, 0.0 }
 0x465   : > { %v1137_v23 = vpack.c.bf16 %v1136_v22, %v1136_v22 }
 0x467   : > { %1212 = vmatmul.bf16.vlgmr.msrb.gmra.mxu2 %v1137_v23 }
 0x4ea   : > { %v1213_v25 = vpop.f32.mrf.mxu2 }
 0x4eb   : > { %v1214_v26 = vadd.f32 %v2186_v24, %v1213_v25  ;;  %v2190_v25 = vld [vmem:[#allocation19 + $0x10] ss:$0 sm:$0xff] }
 0x4ed   : > { %1217 = vadd.xlane.f32.xlu0 %v1214_v26  ;;  %v1220_v27 = vmul.f32 %v1214_v26, %v1214_v26 }
 0x4ef   : > { %1221 = vadd.xlane.f32.xlu1 %v1220_v27 }
 0x4f2   : > { %v1215_v28 = vpop.f32.mrf.mxu2 }
 0x4f3   : > { %v2191_v28 = vld [vmem:[#allocation19 + $0x11] ss:$0 sm:$0xff] }
 0x560   : > { %v1218_v37 = vpop.xlane.xlu0 %1217 }
 0x561   : > { %v1219_v39 = vmul.f32 0.03125, %v1218_v37 }
 0x562   : > { %v1222_v40 = vpop.xlane.xlu1 %1221 }
 0x563   : > { %v1224_v41 = vmul.f32 %v1219_v39, %v1219_v39  ;;  %v1223_v42 = vmul.f32 0.03125, %v1222_v40  ;;  %v1226_v51 = vsub.f32 %v1214_v26, %v1219_v39 }
 0x565   : > { %v1225_v43 = vsub.f32 %v1223_v42, %v1224_v41 }
 0x567   : > { %v1227_v44 = vadd.f32 1e-05, %v1225_v43 }
 0x569   : > { %2199 = vrsqrt.f32 %v1227_v44  ;;  %vm1234_vm10 = vweird.f32 %v1227_v44 }
 0x56f   : > { %v2200_v45 = vpop.eup %2199 }
 0x570   : > { %v1229_v46 = vmul.f32 %v2200_v45, %v1227_v44  ;;  %vm1235_vm9 = vweird.f32 %v2200_v45 }
 0x571   : > { %vm1236_vm11 = vmor %vm1234_vm10, %vm1235_vm9 }
 0x572   : > { %v1230_v47 = vmul.f32 %v2200_v45, %v1229_v46 }
 0x574   : > { %v1231_v48 = vmul.f32 0.5, %v1230_v47 }
 0x576   : > { %v1232_v49 = vsub.f32 1.5, %v1231_v48 }
 0x578   : > { %v1233_v50 = vmul.f32 %v2200_v45, %v1232_v49 }
 0x57a   : > { %v1237_v54 = vsel %vm1236_vm11, %v2200_v45, %v1233_v50 }
 0x57b   : > { %v1238_v56 = vmul.f32 %v1237_v54, %v1226_v51 }
 0x57d   : > { %v1241_v58 = vmul.f32 %v2187_v52, %v1238_v56 }
 0x57f   : > { %v1244_v60 = vadd.f32 %v2188_v57, %v1241_v58 }
 0x581   : > { %v1245_v32 = vadd.f32 %v1244_v60, %v1026_v59 }
 0x583   : > { %v1246_v61 = vmax.f32 %v1245_v32, 0.0 }
 0x585   : > { %v1247_v62 = vpack.c.bf16 %v1246_v61, %v1246_v61 }
 0x587   : > { %1322 = vmatmul.bf16.vlgmr.msrb.gmra.mxu3 %v1247_v62 }
 0x60a   : > { %v1323_v0 = vpop.f32.mrf.mxu3 }
 0x60b   : > { %v1324_v1 = vadd.f32 %v2189_v63, %v1323_v0 }
 0x60d   : > { %1327 = vadd.xlane.f32.xlu2 %v1324_v1  ;;  %v1330_v2 = vmul.f32 %v1324_v1, %v1324_v1 }
 0x60f   : > { %1331 = vadd.xlane.f32.xlu0 %v1330_v2 }
 0x612   : > { %v1325_v3 = vpop.f32.mrf.mxu3 }
 0x680   : > { %v1328_v11 = vpop.xlane.xlu2 %1327 }
 0x681   : > { %v1329_v12 = vmul.f32 0.03125, %v1328_v11 }
 0x682   : > { %v1332_v13 = vpop.xlane.xlu0 %1331 }
 0x683   : > { %v1334_v14 = vmul.f32 %v1329_v12, %v1329_v12  ;;  %v1333_v15 = vmul.f32 0.03125, %v1332_v13  ;;  %v1336_v24 = vsub.f32 %v1324_v1, %v1329_v12 }
 0x685   : > { %v1335_v16 = vsub.f32 %v1333_v15, %v1334_v14 }
 0x687   : > { %v1337_v17 = vadd.f32 1e-05, %v1335_v16 }
 0x689   : > { %2201 = vrsqrt.f32 %v1337_v17  ;;  %vm1344_vm13 = vweird.f32 %v1337_v17 }
 0x68f   : > { %v2202_v18 = vpop.eup %2201 }
 0x690   : > { %v1339_v19 = vmul.f32 %v2202_v18, %v1337_v17  ;;  %vm1345_vm12 = vweird.f32 %v2202_v18 }
 0x691   : > { %vm1346_vm14 = vmor %vm1344_vm13, %vm1345_vm12 }
 0x692   : > { %v1340_v20 = vmul.f32 %v2202_v18, %v1339_v19 }
 0x694   : > { %v1341_v21 = vmul.f32 0.5, %v1340_v20 }
 0x696   : > { %v1342_v22 = vsub.f32 1.5, %v1341_v21 }
 0x698   : > { %v1343_v23 = vmul.f32 %v2202_v18, %v1342_v22 }
 0x69a   : > { %v1347_v26 = vsel %vm1346_vm14, %v2202_v18, %v1343_v23 }
 0x69b   : > { %v1348_v27 = vmul.f32 %v1347_v26, %v1336_v24 }
 0x69d   : > { %v1351_v29 = vmul.f32 %v2190_v25, %v1348_v27 }
 0x69f   : > { %v1354_v30 = vadd.f32 %v2191_v28, %v1351_v29 }
 0x6a1   : > { %v1355_v31 = vmax.f32 %v1354_v30, 0.0 }
 0x6a3   : > { %v1356_v33 = vpack.c.bf16 %v1355_v31, %v1355_v31 }
 0x6a5   : > { %1431 = vmatmul.bf16.vlgmr.msra.gmra.mxu0 %v1356_v33 }
 0x722   : > { %v1432_v37 = vpop.f32.mrf.mxu0 }
 0x723   : > { %v1433_v38 = vadd.f32 %v2192_v36, %v1432_v37 }
 0x725   : > { %v1439_v39 = vsel %vm1438_vm15, %v1433_v38, -1e+30 }
 0x726   : > { %1440 = vmax.xlane.f32.xlu1 %v1439_v39 }
 0x72a   : > { %v1434_v40 = vpop.f32.mrf.mxu0 }
 0x799   : > { %v1441_v41 = vpop.xlane.xlu1 %1440 }
 0x79a   : > { %v1442_v42 = vsub.f32 %v1439_v39, %v1441_v41 }
 0x79c   : > { %v1443_v43 = vmul.f32 1.442695, %v1442_v42 }
 0x79e   : > { %2203 = vpow2.f32 %v1443_v43 }
 0x7a4   : > { %v2204_v44 = vpop.eup %2203 }
 0x7a5   : > { %1445 = vadd.xlane.f32.xlu2 %v2204_v44 }
 0x818   : > { %v1446_v45 = vpop.xlane.xlu2 %1445 }
 0x819   : > { %2205 = vrcp.f32 %v1446_v45 }
 0x81f   : > { %v2206_v46 = vpop.eup %2205 }
 0x820   : > { %v1448_v47 = vmul.f32 %v2206_v46, %v2204_v44 }
 0x822   : > { %1449 = vst [vmem:[%s568_s12] sm:$0xff] %v1448_v47 }
 0x823   : > { %2564 = shalt.err (!%p2561_p9)
}
 0x824   : > { %2065 = dma.vmem_to_hbm [thread:$0]  (%p2843_p4), %s1464_s27, 128, %s1466_s16, %s1451_s14  }
 0x825 PF: > { %s1477_s29 = sand.u32 1, %s2611_s17   ;;  %p2979_p10 = scmp.ge.s32.totalorder %s2623_s20, 2 }
 0x826   : > { %s1478_s5 = scalar_lea.sflag [#allocation4], %s1477_s29 }
 0x827   : > { %p2103_p13 = pnand %p2979_p10, %p2847_p6 }
 0x829   : > { %p2104_p11 = pneg %p2103_p13 }
 0x82b   : > { %2606 = dma.done.wait (%p2104_p11), %s1478_s5, 128  }
 0x82c   : > { %2608 = vsyncadd (%p2104_p11), %s1478_s5, 4294967168  ;;  %p29_p0 = scmp.ge.s32.totalorder %s2817_s23, 4   ;;  %s2980_s17 = smov %s2615_s18 }
 0x82d   : > { %s2981_s18 = smov %s2619_s19  ;;  %s2982_s19 = smov %s2828_s22 }
 0x82e   : > { %s2983_s20 = smov %s2817_s23  ;;  %31 = sbr.rel (!%p29_p0) target bundleno = 17 (0x11), region = 149 }
 0x833   :  { %1484 = vsyncpa [#allocation3], 1 }
 0x834   :  { %1486 = vsyncpa [#allocation3 + $0x1], 1 }
 0x835   :  { %1487 = vsyncpa [#allocation6], 1 }
 0x836   :  { %1488 = vsyncpa [#allocation9], 1 }
 0x837   :  { %1489 = vsyncpa [#allocation12], 1 }
 0x838   :  { %1490 = vsyncpa [#allocation15], 1 }
 0x839   :  { %1491 = vsyncpa [#allocation18], 1 }
 0x83a   :  { %1492 = vsyncpa [#allocation4], 1 }
 0x83b   :  { %1494 = vsyncpa [#allocation4 + $0x1], 1 }

</bundles_post_ra>
